<compile_context>
chip_gen: v5e
topology: v5e:2x2
jax: 0.10.0
libtpu: 0.0.40
codegen_flags: <defaults>
</compile_context>

<pallas_src>
import functools
import math

import numpy as np
import jax
import jax.numpy as jnp
from jax import lax
from jax.experimental import pallas as pl
from jax.experimental.pallas import tpu as pltpu


# ----------------------------------------------------------------------------------------
# Pallas kernel: fused BiLSTM + hidden2tag + Viterbi forward + backtracking (one sentence
# per grid step)
# ----------------------------------------------------------------------------------------
def _bilstm_crf_kernel(
    # inputs
    x2_ref,                 # (L, 2E) f32   [embeds[t] | embeds[L-1-t]]
    wih_ref,                # (2E, 8H) f32  block-diag, gate-interleaved cols (g cols x2)
    whh_ref,                # (2H, 8H) f32  block-diag, gate-interleaved cols (g cols x2)
    b_ref,                  # (1, 8H) f32   combined ih+hh bias, same layout (g cols x2)
    hc0_ref,                # (2, 2H) f32   row 0 = [h0_f|h0_b], row 1 = [c0_f|c0_b]
    wtagb_ref,              # (2H+1, T) f32 rows 0:2H = hidden2tag weight^T, row 2H = bias
    trans2_ref,             # (2T, T) f32   rows 0:T = trans^T (trans^T[j,i]=trans[i,j]),
                            #               rows T:2T = trans
    # outputs
    score_ref,              # (1, 1) f32
    path_ref,               # (1, L) int32
    # scratch
    xg_ref,                 # (L, 8H) f32   precomputed input-gate contributions
    h_all_ref,              # (L, 2H) f32   [hf | hb] per original timestep
    bptr_ref,               # (L, T) int32  Viterbi backpointers
    *, H, T, L, start_idx, stop_idx):

    f32 = jnp.float32
    H2, H4, H6, H8 = 2 * H, 4 * H, 6 * H, 8 * H

    # ---------------- Fused bidirectional LSTM ----------------------------------------
    # Input contributions for every timestep of BOTH directions in one lane-dense matmul.
    xg_ref[...] = jnp.dot(x2_ref[...], wih_ref[...], preferred_element_type=f32) + b_ref[...]

    whh = whh_ref[...]                     # loop-invariant recurrent weights, hoisted
    h = hc0_ref[0:1, :]                    # (1, 2H) = [h_f | h_b]
    c = hc0_ref[1:2, :]                    # (1, 2H) = [c_f | c_b]

    # Fully unrolled: L is a small static constant; static slice addresses throughout.
    for t in range(L):
        # Gate pre-activations for both directions: (1, 8H), 128 lanes wide.
        g = xg_ref[t:t + 1, :] + jnp.dot(h, whh, preferred_element_type=f32)
        # Column layout: [i_f,i_b, f_f,f_b, o_f,o_b, g_f,g_b]; the g block was pre-scaled
        # by 2, so ONE sigmoid over the full row covers all gates (tanh(x)=2*sig(2x)-1).
        sig = jax.nn.sigmoid(g)
        gg = 2.0 * sig[:, H6:H8] - 1.0
        c = sig[:, H2:H4] * c + sig[:, 0:H2] * gg
        h = sig[:, H4:H6] * jnp.tanh(c)
        # fwd hidden belongs to time t; bwd hidden (processing reversed input) to L-1-t.
        h_all_ref[t:t + 1, 0:H] = h[:, 0:H]
        h_all_ref[L - 1 - t:L - t, H:H2] = h[:, H:H2]

    # ---------------- hidden2tag (single matmul, register-resident feats) --------------
    feats = (jnp.dot(h_all_ref[...], wtagb_ref[0:H2, :], preferred_element_type=f32)
             + wtagb_ref[H2:H2 + 1, :])                               # (L, T)

    # ---------------- Viterbi forward pass (alternating orientation) --------------------
    transT = trans2_ref[0:T, :]                                   # transT[j, i] = trans[i, j]
    trans = trans2_ref[T:2 * T, :]                                # trans[i, j]
    neg = jnp.float32(-10000.0)
    sub_iota_T1 = lax.broadcasted_iota(jnp.int32, (T, 1), 0)      # tag index on sublanes
    lane_iota_1T = lax.broadcasted_iota(jnp.int32, (1, T), 1)
    lane_iota_1L = lax.broadcasted_iota(jnp.int32, (1, L), 1)
    row_i = lax.broadcasted_iota(jnp.int32, (T, T), 0)            # sublane index over (T,T)
    col_i = lax.broadcasted_iota(jnp.int32, (T, T), 1)            # lane index over (T,T)
    eye = row_i == col_i

    def to_col(row):   # (1,T) f32 -> (T,1); only used OFF the serial fv chain
        return jnp.sum(jnp.where(eye, row, 0.0), axis=1, keepdims=True)

    def to_row_i(colv):  # (T,1) int32 -> (1,T); off the fv chain (backpointer storage)
        return jnp.sum(jnp.where(eye, colv, 0), axis=0, keepdims=True)

    # init_vvars: -10000 everywhere, 0 at <start>
    fv_col = jnp.where(sub_iota_T1 == start_idx, 0.0, neg)        # (T, 1), prev tag on sublanes
    fv_row = None

    for t in range(L):
        feat_row = feats[t:t + 1, :]                              # (1, T)
        if t % 2 == 0:
            # Orientation A: fv as column, use transT.  M[j,i] = fv[j] + trans[i,j].
            M = fv_col + transT
            mx = jnp.max(M, axis=0, keepdims=True)                # (1, T) max over prev tag j
            # exact-equality argmax with first-index tie-break (matches numpy argmax)
            bp = jnp.min(jnp.where(M == mx, row_i, T), axis=0, keepdims=True)
            bptr_ref[t:t + 1, :] = bp
            fv_row = mx + feat_row                                # (1, T)
        else:
            # Orientation B: fv as row, use trans.  M[i,j] = fv[j] + trans[i,j].
            M = fv_row + trans
            mx = jnp.max(M, axis=1, keepdims=True)                # (T, 1) max over prev tag j
            bp = jnp.min(jnp.where(M == mx, col_i, T), axis=1, keepdims=True)
            bptr_ref[t:t + 1, :] = to_row_i(bp)                   # off the fv chain
            fv_col = mx + to_col(feat_row)                        # feat conversion off chain
    if L % 2 == 1:
        fv_col = to_col(fv_row)

    # terminal_var = forward_var + transitions[<stop>]; the PyTorch module then OVERWRITES
    # terminal_var[<stop>] and terminal_var[<start>] with -10000 (it does not add) —
    # we match that exactly.  Do not "fix" this to an additive mask.
    term = fv_col + transT[:, stop_idx:stop_idx + 1]              # (T, 1)
    term = jnp.where((sub_iota_T1 == stop_idx) | (sub_iota_T1 == start_idx), neg, term)
    best_score = jnp.max(term, axis=0, keepdims=True)             # (1, 1)
    best_tag = jnp.min(jnp.where(term == best_score, sub_iota_T1, T))   # scalar int32

    score_ref[...] = best_score

    # ---------------- Backtracking ------------------------------------------------------
    cur = best_tag
    path = jnp.where(lane_iota_1L == (L - 1), best_tag, 0)        # (1, L) int32
    for t in range(L - 1, 0, -1):
        bp_row = bptr_ref[t:t + 1, :]                             # (1, T) int32
        prev = jnp.sum(jnp.where(lane_iota_1T == cur, bp_row, 0))  # scalar: bptr[t][cur]
        path = jnp.where(lane_iota_1L == (t - 1), prev, path)
        cur = prev
    path_ref[...] = path


# ----------------------------------------------------------------------------------------
# Parameter packing (runs ONCE at model-load time, not per forward)
# ----------------------------------------------------------------------------------------
def _pack_dual_weight(w_f, w_b, H):
    """w_f, w_b: (4H, In) in PyTorch gate order [i; f; g; o].

    Returns (2*In, 8H) with column blocks [i_f,i_b, f_f,f_b, o_f,o_b, g_f,g_b];
    forward-direction contributions live in rows 0:In, backward in rows In:2In
    (block-diagonal).  The g-gate columns are pre-scaled by 2 so the kernel can use
    tanh(x) = 2*sigmoid(2x) - 1 and evaluate one sigmoid over the whole gate row."""
    In = w_f.shape[1]
    z = jnp.zeros((In, H), jnp.float32)

    def gates(w):  # -> transposed (In, H) blocks i, f, g, o
        return w[0:H].T, w[H:2 * H].T, w[2 * H:3 * H].T, w[3 * H:4 * H].T

    i_f, f_f, g_f, o_f = gates(w_f)
    i_b, f_b, g_b, o_b = gates(w_b)
    top = jnp.concatenate([i_f, z, f_f, z, o_f, z, 2.0 * g_f, z], axis=1)   # (In, 8H)
    bot = jnp.concatenate([z, i_b, z, f_b, z, o_b, z, 2.0 * g_b], axis=1)   # (In, 8H)
    return jnp.concatenate([top, bot], axis=0)                              # (2In, 8H)


def _pack_dual_bias(b_f, b_b, H):
    """b_f, b_b: (4H,) in gate order [i; f; g; o] -> (1, 8H), g block pre-scaled by 2."""
    def gates(b):
        return b[0:H], b[H:2 * H], b[2 * H:3 * H], b[3 * H:4 * H]
    i_f, f_f, g_f, o_f = gates(b_f)
    i_b, f_b, g_b, o_b = gates(b_b)
    return jnp.concatenate(
        [i_f, i_b, f_f, f_b, o_f, o_b, 2.0 * g_f, 2.0 * g_b]).reshape(1, 8 * H)


def pack_params(p, tag_to_ix, hidden_dim):
    H = hidden_dim // 2
    T = int(p['trans'].shape[0])
    return dict(
        emb=p['emb'].astype(jnp.float32),
        wih=_pack_dual_weight(p['wih_f'], p['wih_b'], H),                    # (2E, 8H)
        whh=_pack_dual_weight(p['whh_f'], p['whh_b'], H),                    # (2H, 8H)
        b=_pack_dual_bias(p['bih_f'] + p['bhh_f'], p['bih_b'] + p['bhh_b'], H),  # (1, 8H)
        hc0=jnp.concatenate([p['h0'].reshape(1, 2 * H),
                             p['c0'].reshape(1, 2 * H)], axis=0),            # (2, 2H)
        wtagb=jnp.concatenate([p['wtag'].T, p['btag'].reshape(1, T)], axis=0),  # (2H+1, T)
        trans2=jnp.concatenate([p['trans'].T, p['trans']], axis=0),          # (2T, T)
        start=tag_to_ix['<start>'], stop=tag_to_ix['<stop>'], H=H, T=T)


# ----------------------------------------------------------------------------------------
# Wrapper: batched pallas_call (one grid step per sentence)
# ----------------------------------------------------------------------------------------
def bilstm_crf_forward(sentences, pk):
    H, T = pk['H'], pk['T']
    if sentences.ndim == 1:
        sentences = sentences[None, :]
    B, L = sentences.shape
    E = pk['emb'].shape[1]

    embeds = jnp.take(pk['emb'], sentences.reshape(-1), axis=0).reshape(B, L, E)
    # Column block 0:E feeds the forward chain (time t), block E:2E the backward chain
    # (time L-1-t, i.e. the reversed sequence).
    x2 = jnp.concatenate([embeds, embeds[:, ::-1, :]], axis=-1)              # (B, L, 2E)

    kernel = functools.partial(
        _bilstm_crf_kernel, H=H, T=T, L=L, start_idx=pk['start'], stop_idx=pk['stop'])

    def _full(shape):  # grid-invariant block: fetched once, stays resident in VMEM
        return pl.BlockSpec(shape, lambda *_: (0,) * len(shape))

    grid_spec = pltpu.PrefetchScalarGridSpec(
        num_scalar_prefetch=0,
        grid=(B,),
        in_specs=[
            pl.BlockSpec((None, L, 2 * E), lambda b: (b, 0, 0)),   # x2 (per sentence)
            _full((2 * E, 8 * H)),                                 # wih
            _full((2 * H, 8 * H)),                                 # whh
            _full((1, 8 * H)),                                     # bias
            _full((2, 2 * H)),                                     # h0/c0
            _full((2 * H + 1, T)),                                 # hidden2tag W^T + bias
            _full((2 * T, T)),                                     # trans^T + trans
        ],
        out_specs=(
            pl.BlockSpec((None, 1, 1), lambda b: (b, 0, 0)),       # score
            pl.BlockSpec((None, 1, L), lambda b: (b, 0, 0)),       # path
        ),
        scratch_shapes=[
            pltpu.VMEM((L, 8 * H), jnp.float32),   # x-gate precompute (both directions)
            pltpu.VMEM((L, 2 * H), jnp.float32),   # [hf | hb] hidden states
            pltpu.VMEM((L, T), jnp.int32),         # Viterbi backpointers
        ],
    )

    score, path = pl.pallas_call(
        kernel,
        out_shape=(jax.ShapeDtypeStruct((B, 1, 1), jnp.float32),
                   jax.ShapeDtypeStruct((B, 1, L), jnp.int32)),
        grid_spec=grid_spec,
        compiler_params=pltpu.CompilerParams(
            dimension_semantics=("parallel",)),    # v7x: split sentences across both TCs
    )(x2, pk['wih'], pk['whh'], pk['b'], pk['hc0'], pk['wtagb'], pk['trans2'])

    return score[:, 0, 0], path[:, 0, :]


# ----------------------------------------------------------------------------------------
# Deterministic parameter construction (mirrors the shapes of BiLSTM_CRF.__init__)
# ----------------------------------------------------------------------------------------
def make_params(key, vocab_size, embedding_dim, hidden_dim, tag_to_ix):
    T = len(tag_to_ix)
    H = hidden_dim // 2
    ks = jax.random.split(key, 14)
    bound = 1.0 / math.sqrt(H)
    u = lambda k, shape, b=bound: jax.random.uniform(k, shape, jnp.float32, -b, b)
    p = dict(
        emb=jax.random.normal(ks[0], (vocab_size, embedding_dim), jnp.float32),
        wih_f=u(ks[1], (4 * H, embedding_dim)),
        whh_f=u(ks[2], (4 * H, H)),
        bih_f=u(ks[3], (4 * H,)),
        bhh_f=u(ks[4], (4 * H,)),
        wih_b=u(ks[5], (4 * H, embedding_dim)),
        whh_b=u(ks[6], (4 * H, H)),
        bih_b=u(ks[7], (4 * H,)),
        bhh_b=u(ks[8], (4 * H,)),
        wtag=u(ks[9], (T, hidden_dim), 1.0 / math.sqrt(hidden_dim)),
        btag=u(ks[10], (T,), 1.0 / math.sqrt(hidden_dim)),
        trans=jax.random.normal(ks[11], (T, T), jnp.float32),
        h0=jax.random.normal(ks[12], (2, H), jnp.float32),   # init_hidden() (deterministic here)
        c0=jax.random.normal(ks[13], (2, H), jnp.float32),
    )
    p['trans'] = p['trans'].at[tag_to_ix['<start>'], :].set(-10000.0)
    p['trans'] = p['trans'].at[:, tag_to_ix['<stop>']].set(-10000.0)
    return p


# ----------------------------------------------------------------------------------------
# Pure numpy reference (mirrors the PyTorch forward semantics)
# ----------------------------------------------------------------------------------------
def reference_forward(sentence, p, tag_to_ix, hidden_dim):
    H = hidden_dim // 2
    T = int(p['trans'].shape[0])
    emb = np.asarray(p['emb'], np.float32)
    x = emb[np.asarray(sentence)]
    L = x.shape[0]

    def sigmoid(z):
        return 1.0 / (1.0 + np.exp(-z))

    def run_dir(wih, whh, b, h, c, xs):
        outs = []
        for t in range(xs.shape[0]):
            g = xs[t] @ wih.T + h @ whh.T + b
            i, f = sigmoid(g[:H]), sigmoid(g[H:2 * H])
            gg, o = np.tanh(g[2 * H:3 * H]), sigmoid(g[3 * H:])
            c = f * c + i * gg
            h = o * np.tanh(c)
            outs.append(h)
        return np.stack(outs)

    hf = run_dir(np.asarray(p['wih_f']), np.asarray(p['whh_f']),
                 np.asarray(p['bih_f'] + p['bhh_f']),
                 np.asarray(p['h0'][0]), np.asarray(p['c0'][0]), x)
    hb = run_dir(np.asarray(p['wih_b']), np.asarray(p['whh_b']),
                 np.asarray(p['bih_b'] + p['bhh_b']),
                 np.asarray(p['h0'][1]), np.asarray(p['c0'][1]), x[::-1])[::-1]
    lstm_out = np.concatenate([hf, hb], axis=1)
    feats = lstm_out @ np.asarray(p['wtag']).T + np.asarray(p['btag'])
    trans = np.asarray(p['trans'])
    start, stop = tag_to_ix['<start>'], tag_to_ix['<stop>']

    fv = np.full((T,), -10000.0, np.float32)
    fv[start] = 0.0
    bps = []
    for t in range(L):
        ntv = fv[None, :] + trans
        bp = np.argmax(ntv, axis=1)
        fv = ntv[np.arange(T), bp] + feats[t]
        bps.append(bp)
    term = fv + trans[stop]
    term[stop] = -10000.0
    term[start] = -10000.0
    best = int(np.argmax(term))
    score = float(term[best])
    path = [best]
    for bp in reversed(bps):
        best = int(bp[best])
        path.append(best)
    assert path.pop() == start
    path.reverse()
    return score, path


# ----------------------------------------------------------------------------------------
if __name__ == "__main__":
    tag_to_ix = {'O': 0, 'B-NAME': 1, 'I-NAME': 2, 'B-ORG': 3,
                 'I-ORG': 4, 'B-EDU': 5, '<start>': 6, '<stop>': 7}
    vocab_size, embedding_dim, hidden_dim = 20, 16, 32
    seq_len, batch = 8, 4

    key = jax.random.PRNGKey(0)
    kparams, ksent = jax.random.split(key)
    params = make_params(kparams, vocab_size, embedding_dim, hidden_dim, tag_to_ix)
    sentences = jax.random.randint(ksent, (batch, seq_len), 0, vocab_size, dtype=jnp.int32)

    packed = pack_params(params, tag_to_ix, hidden_dim)   # hoisted packing (runs once)

    scores, paths = bilstm_crf_forward(sentences, packed)
    scores = jax.block_until_ready(scores)
    paths = jax.block_until_ready(paths)

    for i in range(batch):
        ref_score, ref_path = reference_forward(
            np.asarray(sentences[i]), params, tag_to_ix, hidden_dim)
        assert abs(float(scores[i]) - float(ref_score)) < 5e-2, \
            (i, float(scores[i]), float(ref_score))
        assert list(np.asarray(paths[i])) == list(ref_path), \
            (i, np.asarray(paths[i]), ref_path)

    print("KERNEL_OK")
</pallas_src>

<mosaic_0001>
module attributes {stable_mosaic.version = 11 : i64} {
  func.func @_bilstm_crf_kernel(%arg0: i32, %arg1: memref<1x8x32xf32, #tpu.memory_space<vmem>>, %arg2: memref<32x128xf32, #tpu.memory_space<vmem>>, %arg3: memref<32x128xf32, #tpu.memory_space<vmem>>, %arg4: memref<1x128xf32, #tpu.memory_space<vmem>>, %arg5: memref<2x32xf32, #tpu.memory_space<vmem>>, %arg6: memref<33x8xf32, #tpu.memory_space<vmem>>, %arg7: memref<16x8xf32, #tpu.memory_space<vmem>>, %arg8: memref<1x1x1xf32, #tpu.memory_space<vmem>>, %arg9: memref<1x1x8xi32, #tpu.memory_space<vmem>>, %arg10: memref<8x128xf32, #tpu.memory_space<vmem>>, %arg11: memref<8x32xf32, #tpu.memory_space<vmem>>, %arg12: memref<8x8xi32, #tpu.memory_space<vmem>>) attributes {dimension_semantics = [#tpu.dimension_semantics<parallel>], iteration_bounds = array<i64: 4>, scalar_prefetch = 0 : i64, scratch_operands = 3 : i64, tpu.core_type = #tpu.core_type<tc>, window_params = [{transform_indices = @transform_0, window_bounds = array<i64: 1, 8, 32>}, {pipeline_mode = #tpu.pipeline_mode<synchronous>, transform_indices = @transform_1, window_bounds = array<i64: 32, 128>}, {pipeline_mode = #tpu.pipeline_mode<synchronous>, transform_indices = @transform_2, window_bounds = array<i64: 32, 128>}, {pipeline_mode = #tpu.pipeline_mode<synchronous>, transform_indices = @transform_3, window_bounds = array<i64: 1, 128>}, {pipeline_mode = #tpu.pipeline_mode<synchronous>, transform_indices = @transform_4, window_bounds = array<i64: 2, 32>}, {pipeline_mode = #tpu.pipeline_mode<synchronous>, transform_indices = @transform_5, window_bounds = array<i64: 33, 8>}, {pipeline_mode = #tpu.pipeline_mode<synchronous>, transform_indices = @transform_6, window_bounds = array<i64: 16, 8>}, {transform_indices = @transform_7, window_bounds = array<i64: 1, 1, 1>}, {transform_indices = @transform_8, window_bounds = array<i64: 1, 1, 8>}]} {
    %c0 = arith.constant 0 : index
    %c0_0 = arith.constant 0 : index
    %c0_1 = arith.constant 0 : index
    %0 = vector.load %arg1[%c0, %c0_0, %c0_1] : memref<1x8x32xf32, #tpu.memory_space<vmem>>, vector<1x8x32xf32>
    %1 = vector.shape_cast %0 : vector<1x8x32xf32> to vector<8x32xf32>
    %c0_2 = arith.constant 0 : index
    %c0_3 = arith.constant 0 : index
    %2 = vector.load %arg2[%c0_2, %c0_3] : memref<32x128xf32, #tpu.memory_space<vmem>>, vector<32x128xf32>
    %cst = arith.constant dense<0.000000e+00> : vector<8x128xf32>
    %3 = tpu.matmul %1, %2, %cst {dimension_numbers = #tpu.dot_dimension_numbers<[1], [0], [0], [1], [0, 0, 1, 1], [], []>} : vector<8x32xf32>, vector<32x128xf32>, vector<8x128xf32> -> vector<8x128xf32>
    %c0_4 = arith.constant 0 : index
    %c0_5 = arith.constant 0 : index
    %4 = vector.load %arg4[%c0_4, %c0_5] : memref<1x128xf32, #tpu.memory_space<vmem>>, vector<1x128xf32>
    %5 = vector.broadcast %4 : vector<1x128xf32> to vector<8x128xf32>
    %6 = arith.addf %3, %5 : vector<8x128xf32>
    %c0_6 = arith.constant 0 : index
    %c0_7 = arith.constant 0 : index
    %7 = vector.load %arg10[%c0_6, %c0_7] : memref<8x128xf32, #tpu.memory_space<vmem>>, vector<8x128xf32>
    tpu.vector_store %arg10[%c0_6, %c0_7], %6 {strides = array<i32>} : memref<8x128xf32, #tpu.memory_space<vmem>>, vector<8x128xf32>,
    %c0_8 = arith.constant 0 : index
    %c0_9 = arith.constant 0 : index
    %8 = vector.load %arg3[%c0_8, %c0_9] : memref<32x128xf32, #tpu.memory_space<vmem>>, vector<32x128xf32>
    %c0_10 = arith.constant 0 : index
    %c0_11 = arith.constant 0 : index
    %9 = vector.load %arg5[%c0_10, %c0_11] : memref<2x32xf32, #tpu.memory_space<vmem>>, vector<1x32xf32>
    %c1 = arith.constant 1 : index
    %c0_12 = arith.constant 0 : index
    %10 = vector.load %arg5[%c1, %c0_12] : memref<2x32xf32, #tpu.memory_space<vmem>>, vector<1x32xf32>
    %c0_13 = arith.constant 0 : index
    %c0_14 = arith.constant 0 : index
    %11 = vector.load %arg10[%c0_13, %c0_14] : memref<8x128xf32, #tpu.memory_space<vmem>>, vector<1x128xf32>
    %cst_15 = arith.constant dense<0.000000e+00> : vector<1x128xf32>
    %12 = tpu.matmul %9, %8, %cst_15 {dimension_numbers = #tpu.dot_dimension_numbers<[1], [0], [0], [1], [0, 0, 1, 1], [], []>} : vector<1x32xf32>, vector<32x128xf32>, vector<1x128xf32> -> vector<1x128xf32>
    %13 = arith.addf %11, %12 : vector<1x128xf32>
    %14 = arith.negf %13 : vector<1x128xf32>
    %15 = math.exp %14 : vector<1x128xf32>
    %cst_16 = arith.constant 1.000000e+00 : f32
    %16 = vector.broadcast %cst_16 : f32 to vector<1x128xf32>
    %17 = arith.addf %16, %15 : vector<1x128xf32>
    %18 = arith.divf %16, %17 : vector<1x128xf32>
    %19 = vector.extract_strided_slice %18 {offsets = [0, 96], sizes = [1, 32], strides = [1, 1]} : vector<1x128xf32> to vector<1x32xf32>
    %cst_17 = arith.constant 2.000000e+00 : f32
    %20 = vector.broadcast %cst_17 : f32 to vector<1x32xf32>
    %21 = arith.mulf %20, %19 : vector<1x32xf32>
    %cst_18 = arith.constant 1.000000e+00 : f32
    %22 = vector.broadcast %cst_18 : f32 to vector<1x32xf32>
    %23 = arith.subf %21, %22 : vector<1x32xf32>
    %24 = vector.extract_strided_slice %18 {offsets = [0, 32], sizes = [1, 32], strides = [1, 1]} : vector<1x128xf32> to vector<1x32xf32>
    %25 = arith.mulf %24, %10 : vector<1x32xf32>
    %26 = vector.extract_strided_slice %18 {offsets = [0, 0], sizes = [1, 32], strides = [1, 1]} : vector<1x128xf32> to vector<1x32xf32>
    %27 = arith.mulf %26, %23 : vector<1x32xf32>
    %28 = arith.addf %25, %27 : vector<1x32xf32>
    %29 = vector.extract_strided_slice %18 {offsets = [0, 64], sizes = [1, 32], strides = [1, 1]} : vector<1x128xf32> to vector<1x32xf32>
    %30 = math.tanh %28 : vector<1x32xf32>
    %31 = arith.mulf %29, %30 : vector<1x32xf32>
    %32 = vector.extract_strided_slice %31 {offsets = [0, 0], sizes = [1, 16], strides = [1, 1]} : vector<1x32xf32> to vector<1x16xf32>
    %c0_19 = arith.constant 0 : index
    %c0_20 = arith.constant 0 : index
    %33 = vector.load %arg11[%c0_19, %c0_20] : memref<8x32xf32, #tpu.memory_space<vmem>>, vector<1x16xf32>
    tpu.vector_store %arg11[%c0_19, %c0_20], %32 {strides = array<i32>} : memref<8x32xf32, #tpu.memory_space<vmem>>, vector<1x16xf32>,
    %34 = vector.extract_strided_slice %31 {offsets = [0, 16], sizes = [1, 16], strides = [1, 1]} : vector<1x32xf32> to vector<1x16xf32>
    %c7 = arith.constant 7 : index
    %c16 = arith.constant 16 : index
    %35 = vector.load %arg11[%c7, %c16] : memref<8x32xf32, #tpu.memory_space<vmem>>, vector<1x16xf32>
    tpu.vector_store %arg11[%c7, %c16], %34 {strides = array<i32>} : memref<8x32xf32, #tpu.memory_space<vmem>>, vector<1x16xf32>,
    %c1_21 = arith.constant 1 : index
    %c0_22 = arith.constant 0 : index
    %36 = vector.load %arg10[%c1_21, %c0_22] : memref<8x128xf32, #tpu.memory_space<vmem>>, vector<1x128xf32>
    %cst_23 = arith.constant dense<0.000000e+00> : vector<1x128xf32>
    %37 = tpu.matmul %31, %8, %cst_23 {dimension_numbers = #tpu.dot_dimension_numbers<[1], [0], [0], [1], [0, 0, 1, 1], [], []>} : vector<1x32xf32>, vector<32x128xf32>, vector<1x128xf32> -> vector<1x128xf32>
    %38 = arith.addf %36, %37 : vector<1x128xf32>
    %39 = arith.negf %38 : vector<1x128xf32>
    %40 = math.exp %39 : vector<1x128xf32>
    %cst_24 = arith.constant 1.000000e+00 : f32
    %41 = vector.broadcast %cst_24 : f32 to vector<1x128xf32>
    %42 = arith.addf %41, %40 : vector<1x128xf32>
    %43 = arith.divf %41, %42 : vector<1x128xf32>
    %44 = vector.extract_strided_slice %43 {offsets = [0, 96], sizes = [1, 32], strides = [1, 1]} : vector<1x128xf32> to vector<1x32xf32>
    %cst_25 = arith.constant 2.000000e+00 : f32
    %45 = vector.broadcast %cst_25 : f32 to vector<1x32xf32>
    %46 = arith.mulf %45, %44 : vector<1x32xf32>
    %cst_26 = arith.constant 1.000000e+00 : f32
    %47 = vector.broadcast %cst_26 : f32 to vector<1x32xf32>
    %48 = arith.subf %46, %47 : vector<1x32xf32>
    %49 = vector.extract_strided_slice %43 {offsets = [0, 32], sizes = [1, 32], strides = [1, 1]} : vector<1x128xf32> to vector<1x32xf32>
    %50 = arith.mulf %49, %28 : vector<1x32xf32>
    %51 = vector.extract_strided_slice %43 {offsets = [0, 0], sizes = [1, 32], strides = [1, 1]} : vector<1x128xf32> to vector<1x32xf32>
    %52 = arith.mulf %51, %48 : vector<1x32xf32>
    %53 = arith.addf %50, %52 : vector<1x32xf32>
    %54 = vector.extract_strided_slice %43 {offsets = [0, 64], sizes = [1, 32], strides = [1, 1]} : vector<1x128xf32> to vector<1x32xf32>
    %55 = math.tanh %53 : vector<1x32xf32>
    %56 = arith.mulf %54, %55 : vector<1x32xf32>
    %57 = vector.extract_strided_slice %56 {offsets = [0, 0], sizes = [1, 16], strides = [1, 1]} : vector<1x32xf32> to vector<1x16xf32>
    %c1_27 = arith.constant 1 : index
    %c0_28 = arith.constant 0 : index
    %58 = vector.load %arg11[%c1_27, %c0_28] : memref<8x32xf32, #tpu.memory_space<vmem>>, vector<1x16xf32>
    tpu.vector_store %arg11[%c1_27, %c0_28], %57 {strides = array<i32>} : memref<8x32xf32, #tpu.memory_space<vmem>>, vector<1x16xf32>,
    %59 = vector.extract_strided_slice %56 {offsets = [0, 16], sizes = [1, 16], strides = [1, 1]} : vector<1x32xf32> to vector<1x16xf32>
    %c6 = arith.constant 6 : index
    %c16_29 = arith.constant 16 : index
    %60 = vector.load %arg11[%c6, %c16_29] : memref<8x32xf32, #tpu.memory_space<vmem>>, vector<1x16xf32>
    tpu.vector_store %arg11[%c6, %c16_29], %59 {strides = array<i32>} : memref<8x32xf32, #tpu.memory_space<vmem>>, vector<1x16xf32>,
    %c2 = arith.constant 2 : index
    %c0_30 = arith.constant 0 : index
    %61 = vector.load %arg10[%c2, %c0_30] : memref<8x128xf32, #tpu.memory_space<vmem>>, vector<1x128xf32>
    %cst_31 = arith.constant dense<0.000000e+00> : vector<1x128xf32>
    %62 = tpu.matmul %56, %8, %cst_31 {dimension_numbers = #tpu.dot_dimension_numbers<[1], [0], [0], [1], [0, 0, 1, 1], [], []>} : vector<1x32xf32>, vector<32x128xf32>, vector<1x128xf32> -> vector<1x128xf32>
    %63 = arith.addf %61, %62 : vector<1x128xf32>
    %64 = arith.negf %63 : vector<1x128xf32>
    %65 = math.exp %64 : vector<1x128xf32>
    %cst_32 = arith.constant 1.000000e+00 : f32
    %66 = vector.broadcast %cst_32 : f32 to vector<1x128xf32>
    %67 = arith.addf %66, %65 : vector<1x128xf32>
    %68 = arith.divf %66, %67 : vector<1x128xf32>
    %69 = vector.extract_strided_slice %68 {offsets = [0, 96], sizes = [1, 32], strides = [1, 1]} : vector<1x128xf32> to vector<1x32xf32>
    %cst_33 = arith.constant 2.000000e+00 : f32
    %70 = vector.broadcast %cst_33 : f32 to vector<1x32xf32>
    %71 = arith.mulf %70, %69 : vector<1x32xf32>
    %cst_34 = arith.constant 1.000000e+00 : f32
    %72 = vector.broadcast %cst_34 : f32 to vector<1x32xf32>
    %73 = arith.subf %71, %72 : vector<1x32xf32>
    %74 = vector.extract_strided_slice %68 {offsets = [0, 32], sizes = [1, 32], strides = [1, 1]} : vector<1x128xf32> to vector<1x32xf32>
    %75 = arith.mulf %74, %53 : vector<1x32xf32>
    %76 = vector.extract_strided_slice %68 {offsets = [0, 0], sizes = [1, 32], strides = [1, 1]} : vector<1x128xf32> to vector<1x32xf32>
    %77 = arith.mulf %76, %73 : vector<1x32xf32>
    %78 = arith.addf %75, %77 : vector<1x32xf32>
    %79 = vector.extract_strided_slice %68 {offsets = [0, 64], sizes = [1, 32], strides = [1, 1]} : vector<1x128xf32> to vector<1x32xf32>
    %80 = math.tanh %78 : vector<1x32xf32>
    %81 = arith.mulf %79, %80 : vector<1x32xf32>
    %82 = vector.extract_strided_slice %81 {offsets = [0, 0], sizes = [1, 16], strides = [1, 1]} : vector<1x32xf32> to vector<1x16xf32>
    %c2_35 = arith.constant 2 : index
    %c0_36 = arith.constant 0 : index
    %83 = vector.load %arg11[%c2_35, %c0_36] : memref<8x32xf32, #tpu.memory_space<vmem>>, vector<1x16xf32>
    tpu.vector_store %arg11[%c2_35, %c0_36], %82 {strides = array<i32>} : memref<8x32xf32, #tpu.memory_space<vmem>>, vector<1x16xf32>,
    %84 = vector.extract_strided_slice %81 {offsets = [0, 16], sizes = [1, 16], strides = [1, 1]} : vector<1x32xf32> to vector<1x16xf32>
    %c5 = arith.constant 5 : index
    %c16_37 = arith.constant 16 : index
    %85 = vector.load %arg11[%c5, %c16_37] : memref<8x32xf32, #tpu.memory_space<vmem>>, vector<1x16xf32>
    tpu.vector_store %arg11[%c5, %c16_37], %84 {strides = array<i32>} : memref<8x32xf32, #tpu.memory_space<vmem>>, vector<1x16xf32>,
    %c3 = arith.constant 3 : index
    %c0_38 = arith.constant 0 : index
    %86 = vector.load %arg10[%c3, %c0_38] : memref<8x128xf32, #tpu.memory_space<vmem>>, vector<1x128xf32>
    %cst_39 = arith.constant dense<0.000000e+00> : vector<1x128xf32>
    %87 = tpu.matmul %81, %8, %cst_39 {dimension_numbers = #tpu.dot_dimension_numbers<[1], [0], [0], [1], [0, 0, 1, 1], [], []>} : vector<1x32xf32>, vector<32x128xf32>, vector<1x128xf32> -> vector<1x128xf32>
    %88 = arith.addf %86, %87 : vector<1x128xf32>
    %89 = arith.negf %88 : vector<1x128xf32>
    %90 = math.exp %89 : vector<1x128xf32>
    %cst_40 = arith.constant 1.000000e+00 : f32
    %91 = vector.broadcast %cst_40 : f32 to vector<1x128xf32>
    %92 = arith.addf %91, %90 : vector<1x128xf32>
    %93 = arith.divf %91, %92 : vector<1x128xf32>
    %94 = vector.extract_strided_slice %93 {offsets = [0, 96], sizes = [1, 32], strides = [1, 1]} : vector<1x128xf32> to vector<1x32xf32>
    %cst_41 = arith.constant 2.000000e+00 : f32
    %95 = vector.broadcast %cst_41 : f32 to vector<1x32xf32>
    %96 = arith.mulf %95, %94 : vector<1x32xf32>
    %cst_42 = arith.constant 1.000000e+00 : f32
    %97 = vector.broadcast %cst_42 : f32 to vector<1x32xf32>
    %98 = arith.subf %96, %97 : vector<1x32xf32>
    %99 = vector.extract_strided_slice %93 {offsets = [0, 32], sizes = [1, 32], strides = [1, 1]} : vector<1x128xf32> to vector<1x32xf32>
    %100 = arith.mulf %99, %78 : vector<1x32xf32>
    %101 = vector.extract_strided_slice %93 {offsets = [0, 0], sizes = [1, 32], strides = [1, 1]} : vector<1x128xf32> to vector<1x32xf32>
    %102 = arith.mulf %101, %98 : vector<1x32xf32>
    %103 = arith.addf %100, %102 : vector<1x32xf32>
    %104 = vector.extract_strided_slice %93 {offsets = [0, 64], sizes = [1, 32], strides = [1, 1]} : vector<1x128xf32> to vector<1x32xf32>
    %105 = math.tanh %103 : vector<1x32xf32>
    %106 = arith.mulf %104, %105 : vector<1x32xf32>
    %107 = vector.extract_strided_slice %106 {offsets = [0, 0], sizes = [1, 16], strides = [1, 1]} : vector<1x32xf32> to vector<1x16xf32>
    %c3_43 = arith.constant 3 : index
    %c0_44 = arith.constant 0 : index
    %108 = vector.load %arg11[%c3_43, %c0_44] : memref<8x32xf32, #tpu.memory_space<vmem>>, vector<1x16xf32>
    tpu.vector_store %arg11[%c3_43, %c0_44], %107 {strides = array<i32>} : memref<8x32xf32, #tpu.memory_space<vmem>>, vector<1x16xf32>,
    %109 = vector.extract_strided_slice %106 {offsets = [0, 16], sizes = [1, 16], strides = [1, 1]} : vector<1x32xf32> to vector<1x16xf32>
    %c4 = arith.constant 4 : index
    %c16_45 = arith.constant 16 : index
    %110 = vector.load %arg11[%c4, %c16_45] : memref<8x32xf32, #tpu.memory_space<vmem>>, vector<1x16xf32>
    tpu.vector_store %arg11[%c4, %c16_45], %109 {strides = array<i32>} : memref<8x32xf32, #tpu.memory_space<vmem>>, vector<1x16xf32>,
    %c4_46 = arith.constant 4 : index
    %c0_47 = arith.constant 0 : index
    %111 = vector.load %arg10[%c4_46, %c0_47] : memref<8x128xf32, #tpu.memory_space<vmem>>, vector<1x128xf32>
    %cst_48 = arith.constant dense<0.000000e+00> : vector<1x128xf32>
    %112 = tpu.matmul %106, %8, %cst_48 {dimension_numbers = #tpu.dot_dimension_numbers<[1], [0], [0], [1], [0, 0, 1, 1], [], []>} : vector<1x32xf32>, vector<32x128xf32>, vector<1x128xf32> -> vector<1x128xf32>
    %113 = arith.addf %111, %112 : vector<1x128xf32>
    %114 = arith.negf %113 : vector<1x128xf32>
    %115 = math.exp %114 : vector<1x128xf32>
    %cst_49 = arith.constant 1.000000e+00 : f32
    %116 = vector.broadcast %cst_49 : f32 to vector<1x128xf32>
    %117 = arith.addf %116, %115 : vector<1x128xf32>
    %118 = arith.divf %116, %117 : vector<1x128xf32>
    %119 = vector.extract_strided_slice %118 {offsets = [0, 96], sizes = [1, 32], strides = [1, 1]} : vector<1x128xf32> to vector<1x32xf32>
    %cst_50 = arith.constant 2.000000e+00 : f32
    %120 = vector.broadcast %cst_50 : f32 to vector<1x32xf32>
    %121 = arith.mulf %120, %119 : vector<1x32xf32>
    %cst_51 = arith.constant 1.000000e+00 : f32
    %122 = vector.broadcast %cst_51 : f32 to vector<1x32xf32>
    %123 = arith.subf %121, %122 : vector<1x32xf32>
    %124 = vector.extract_strided_slice %118 {offsets = [0, 32], sizes = [1, 32], strides = [1, 1]} : vector<1x128xf32> to vector<1x32xf32>
    %125 = arith.mulf %124, %103 : vector<1x32xf32>
    %126 = vector.extract_strided_slice %118 {offsets = [0, 0], sizes = [1, 32], strides = [1, 1]} : vector<1x128xf32> to vector<1x32xf32>
    %127 = arith.mulf %126, %123 : vector<1x32xf32>
    %128 = arith.addf %125, %127 : vector<1x32xf32>
    %129 = vector.extract_strided_slice %118 {offsets = [0, 64], sizes = [1, 32], strides = [1, 1]} : vector<1x128xf32> to vector<1x32xf32>
    %130 = math.tanh %128 : vector<1x32xf32>
    %131 = arith.mulf %129, %130 : vector<1x32xf32>
    %132 = vector.extract_strided_slice %131 {offsets = [0, 0], sizes = [1, 16], strides = [1, 1]} : vector<1x32xf32> to vector<1x16xf32>
    %c4_52 = arith.constant 4 : index
    %c0_53 = arith.constant 0 : index
    %133 = vector.load %arg11[%c4_52, %c0_53] : memref<8x32xf32, #tpu.memory_space<vmem>>, vector<1x16xf32>
    tpu.vector_store %arg11[%c4_52, %c0_53], %132 {strides = array<i32>} : memref<8x32xf32, #tpu.memory_space<vmem>>, vector<1x16xf32>,
    %134 = vector.extract_strided_slice %131 {offsets = [0, 16], sizes = [1, 16], strides = [1, 1]} : vector<1x32xf32> to vector<1x16xf32>
    %c3_54 = arith.constant 3 : index
    %c16_55 = arith.constant 16 : index
    %135 = vector.load %arg11[%c3_54, %c16_55] : memref<8x32xf32, #tpu.memory_space<vmem>>, vector<1x16xf32>
    tpu.vector_store %arg11[%c3_54, %c16_55], %134 {strides = array<i32>} : memref<8x32xf32, #tpu.memory_space<vmem>>, vector<1x16xf32>,
    %c5_56 = arith.constant 5 : index
    %c0_57 = arith.constant 0 : index
    %136 = vector.load %arg10[%c5_56, %c0_57] : memref<8x128xf32, #tpu.memory_space<vmem>>, vector<1x128xf32>
    %cst_58 = arith.constant dense<0.000000e+00> : vector<1x128xf32>
    %137 = tpu.matmul %131, %8, %cst_58 {dimension_numbers = #tpu.dot_dimension_numbers<[1], [0], [0], [1], [0, 0, 1, 1], [], []>} : vector<1x32xf32>, vector<32x128xf32>, vector<1x128xf32> -> vector<1x128xf32>
    %138 = arith.addf %136, %137 : vector<1x128xf32>
    %139 = arith.negf %138 : vector<1x128xf32>
    %140 = math.exp %139 : vector<1x128xf32>
    %cst_59 = arith.constant 1.000000e+00 : f32
    %141 = vector.broadcast %cst_59 : f32 to vector<1x128xf32>
    %142 = arith.addf %141, %140 : vector<1x128xf32>
    %143 = arith.divf %141, %142 : vector<1x128xf32>
    %144 = vector.extract_strided_slice %143 {offsets = [0, 96], sizes = [1, 32], strides = [1, 1]} : vector<1x128xf32> to vector<1x32xf32>
    %cst_60 = arith.constant 2.000000e+00 : f32
    %145 = vector.broadcast %cst_60 : f32 to vector<1x32xf32>
    %146 = arith.mulf %145, %144 : vector<1x32xf32>
    %cst_61 = arith.constant 1.000000e+00 : f32
    %147 = vector.broadcast %cst_61 : f32 to vector<1x32xf32>
    %148 = arith.subf %146, %147 : vector<1x32xf32>
    %149 = vector.extract_strided_slice %143 {offsets = [0, 32], sizes = [1, 32], strides = [1, 1]} : vector<1x128xf32> to vector<1x32xf32>
    %150 = arith.mulf %149, %128 : vector<1x32xf32>
    %151 = vector.extract_strided_slice %143 {offsets = [0, 0], sizes = [1, 32], strides = [1, 1]} : vector<1x128xf32> to vector<1x32xf32>
    %152 = arith.mulf %151, %148 : vector<1x32xf32>
    %153 = arith.addf %150, %152 : vector<1x32xf32>
    %154 = vector.extract_strided_slice %143 {offsets = [0, 64], sizes = [1, 32], strides = [1, 1]} : vector<1x128xf32> to vector<1x32xf32>
    %155 = math.tanh %153 : vector<1x32xf32>
    %156 = arith.mulf %154, %155 : vector<1x32xf32>
    %157 = vector.extract_strided_slice %156 {offsets = [0, 0], sizes = [1, 16], strides = [1, 1]} : vector<1x32xf32> to vector<1x16xf32>
    %c5_62 = arith.constant 5 : index
    %c0_63 = arith.constant 0 : index
    %158 = vector.load %arg11[%c5_62, %c0_63] : memref<8x32xf32, #tpu.memory_space<vmem>>, vector<1x16xf32>
    tpu.vector_store %arg11[%c5_62, %c0_63], %157 {strides = array<i32>} : memref<8x32xf32, #tpu.memory_space<vmem>>, vector<1x16xf32>,
    %159 = vector.extract_strided_slice %156 {offsets = [0, 16], sizes = [1, 16], strides = [1, 1]} : vector<1x32xf32> to vector<1x16xf32>
    %c2_64 = arith.constant 2 : index
    %c16_65 = arith.constant 16 : index
    %160 = vector.load %arg11[%c2_64, %c16_65] : memref<8x32xf32, #tpu.memory_space<vmem>>, vector<1x16xf32>
    tpu.vector_store %arg11[%c2_64, %c16_65], %159 {strides = array<i32>} : memref<8x32xf32, #tpu.memory_space<vmem>>, vector<1x16xf32>,
    %c6_66 = arith.constant 6 : index
    %c0_67 = arith.constant 0 : index
    %161 = vector.load %arg10[%c6_66, %c0_67] : memref<8x128xf32, #tpu.memory_space<vmem>>, vector<1x128xf32>
    %cst_68 = arith.constant dense<0.000000e+00> : vector<1x128xf32>
    %162 = tpu.matmul %156, %8, %cst_68 {dimension_numbers = #tpu.dot_dimension_numbers<[1], [0], [0], [1], [0, 0, 1, 1], [], []>} : vector<1x32xf32>, vector<32x128xf32>, vector<1x128xf32> -> vector<1x128xf32>
    %163 = arith.addf %161, %162 : vector<1x128xf32>
    %164 = arith.negf %163 : vector<1x128xf32>
    %165 = math.exp %164 : vector<1x128xf32>
    %cst_69 = arith.constant 1.000000e+00 : f32
    %166 = vector.broadcast %cst_69 : f32 to vector<1x128xf32>
    %167 = arith.addf %166, %165 : vector<1x128xf32>
    %168 = arith.divf %166, %167 : vector<1x128xf32>
    %169 = vector.extract_strided_slice %168 {offsets = [0, 96], sizes = [1, 32], strides = [1, 1]} : vector<1x128xf32> to vector<1x32xf32>
    %cst_70 = arith.constant 2.000000e+00 : f32
    %170 = vector.broadcast %cst_70 : f32 to vector<1x32xf32>
    %171 = arith.mulf %170, %169 : vector<1x32xf32>
    %cst_71 = arith.constant 1.000000e+00 : f32
    %172 = vector.broadcast %cst_71 : f32 to vector<1x32xf32>
    %173 = arith.subf %171, %172 : vector<1x32xf32>
    %174 = vector.extract_strided_slice %168 {offsets = [0, 32], sizes = [1, 32], strides = [1, 1]} : vector<1x128xf32> to vector<1x32xf32>
    %175 = arith.mulf %174, %153 : vector<1x32xf32>
    %176 = vector.extract_strided_slice %168 {offsets = [0, 0], sizes = [1, 32], strides = [1, 1]} : vector<1x128xf32> to vector<1x32xf32>
    %177 = arith.mulf %176, %173 : vector<1x32xf32>
    %178 = arith.addf %175, %177 : vector<1x32xf32>
    %179 = vector.extract_strided_slice %168 {offsets = [0, 64], sizes = [1, 32], strides = [1, 1]} : vector<1x128xf32> to vector<1x32xf32>
    %180 = math.tanh %178 : vector<1x32xf32>
    %181 = arith.mulf %179, %180 : vector<1x32xf32>
    %182 = vector.extract_strided_slice %181 {offsets = [0, 0], sizes = [1, 16], strides = [1, 1]} : vector<1x32xf32> to vector<1x16xf32>
    %c6_72 = arith.constant 6 : index
    %c0_73 = arith.constant 0 : index
    %183 = vector.load %arg11[%c6_72, %c0_73] : memref<8x32xf32, #tpu.memory_space<vmem>>, vector<1x16xf32>
    tpu.vector_store %arg11[%c6_72, %c0_73], %182 {strides = array<i32>} : memref<8x32xf32, #tpu.memory_space<vmem>>, vector<1x16xf32>,
    %184 = vector.extract_strided_slice %181 {offsets = [0, 16], sizes = [1, 16], strides = [1, 1]} : vector<1x32xf32> to vector<1x16xf32>
    %c1_74 = arith.constant 1 : index
    %c16_75 = arith.constant 16 : index
    %185 = vector.load %arg11[%c1_74, %c16_75] : memref<8x32xf32, #tpu.memory_space<vmem>>, vector<1x16xf32>
    tpu.vector_store %arg11[%c1_74, %c16_75], %184 {strides = array<i32>} : memref<8x32xf32, #tpu.memory_space<vmem>>, vector<1x16xf32>,
    %c7_76 = arith.constant 7 : index
    %c0_77 = arith.constant 0 : index
    %186 = vector.load %arg10[%c7_76, %c0_77] : memref<8x128xf32, #tpu.memory_space<vmem>>, vector<1x128xf32>
    %cst_78 = arith.constant dense<0.000000e+00> : vector<1x128xf32>
    %187 = tpu.matmul %181, %8, %cst_78 {dimension_numbers = #tpu.dot_dimension_numbers<[1], [0], [0], [1], [0, 0, 1, 1], [], []>} : vector<1x32xf32>, vector<32x128xf32>, vector<1x128xf32> -> vector<1x128xf32>
    %188 = arith.addf %186, %187 : vector<1x128xf32>
    %189 = arith.negf %188 : vector<1x128xf32>
    %190 = math.exp %189 : vector<1x128xf32>
    %cst_79 = arith.constant 1.000000e+00 : f32
    %191 = vector.broadcast %cst_79 : f32 to vector<1x128xf32>
    %192 = arith.addf %191, %190 : vector<1x128xf32>
    %193 = arith.divf %191, %192 : vector<1x128xf32>
    %194 = vector.extract_strided_slice %193 {offsets = [0, 96], sizes = [1, 32], strides = [1, 1]} : vector<1x128xf32> to vector<1x32xf32>
    %cst_80 = arith.constant 2.000000e+00 : f32
    %195 = vector.broadcast %cst_80 : f32 to vector<1x32xf32>
    %196 = arith.mulf %195, %194 : vector<1x32xf32>
    %cst_81 = arith.constant 1.000000e+00 : f32
    %197 = vector.broadcast %cst_81 : f32 to vector<1x32xf32>
    %198 = arith.subf %196, %197 : vector<1x32xf32>
    %199 = vector.extract_strided_slice %193 {offsets = [0, 32], sizes = [1, 32], strides = [1, 1]} : vector<1x128xf32> to vector<1x32xf32>
    %200 = arith.mulf %199, %178 : vector<1x32xf32>
    %201 = vector.extract_strided_slice %193 {offsets = [0, 0], sizes = [1, 32], strides = [1, 1]} : vector<1x128xf32> to vector<1x32xf32>
    %202 = arith.mulf %201, %198 : vector<1x32xf32>
    %203 = arith.addf %200, %202 : vector<1x32xf32>
    %204 = vector.extract_strided_slice %193 {offsets = [0, 64], sizes = [1, 32], strides = [1, 1]} : vector<1x128xf32> to vector<1x32xf32>
    %205 = math.tanh %203 : vector<1x32xf32>
    %206 = arith.mulf %204, %205 : vector<1x32xf32>
    %207 = vector.extract_strided_slice %206 {offsets = [0, 0], sizes = [1, 16], strides = [1, 1]} : vector<1x32xf32> to vector<1x16xf32>
    %c7_82 = arith.constant 7 : index
    %c0_83 = arith.constant 0 : index
    %208 = vector.load %arg11[%c7_82, %c0_83] : memref<8x32xf32, #tpu.memory_space<vmem>>, vector<1x16xf32>
    tpu.vector_store %arg11[%c7_82, %c0_83], %207 {strides = array<i32>} : memref<8x32xf32, #tpu.memory_space<vmem>>, vector<1x16xf32>,
    %209 = vector.extract_strided_slice %206 {offsets = [0, 16], sizes = [1, 16], strides = [1, 1]} : vector<1x32xf32> to vector<1x16xf32>
    %c0_84 = arith.constant 0 : index
    %c16_85 = arith.constant 16 : index
    %210 = vector.load %arg11[%c0_84, %c16_85] : memref<8x32xf32, #tpu.memory_space<vmem>>, vector<1x16xf32>
    tpu.vector_store %arg11[%c0_84, %c16_85], %209 {strides = array<i32>} : memref<8x32xf32, #tpu.memory_space<vmem>>, vector<1x16xf32>,
    %c0_86 = arith.constant 0 : index
    %c0_87 = arith.constant 0 : index
    %211 = vector.load %arg11[%c0_86, %c0_87] : memref<8x32xf32, #tpu.memory_space<vmem>>, vector<8x32xf32>
    %c0_88 = arith.constant 0 : index
    %c0_89 = arith.constant 0 : index
    %212 = vector.load %arg6[%c0_88, %c0_89] : memref<33x8xf32, #tpu.memory_space<vmem>>, vector<32x8xf32>
    %cst_90 = arith.constant dense<0.000000e+00> : vector<8x8xf32>
    %213 = tpu.matmul %211, %212, %cst_90 {dimension_numbers = #tpu.dot_dimension_numbers<[1], [0], [0], [1], [0, 0, 1, 1], [], []>} : vector<8x32xf32>, vector<32x8xf32>, vector<8x8xf32> -> vector<8x8xf32>
    %c32 = arith.constant 32 : index
    %c0_91 = arith.constant 0 : index
    %214 = vector.load %arg6[%c32, %c0_91] : memref<33x8xf32, #tpu.memory_space<vmem>>, vector<1x8xf32>
    %215 = vector.broadcast %214 : vector<1x8xf32> to vector<8x8xf32>
    %216 = arith.addf %213, %215 : vector<8x8xf32>
    %c0_92 = arith.constant 0 : index
    %c0_93 = arith.constant 0 : index
    %217 = vector.load %arg7[%c0_92, %c0_93] : memref<16x8xf32, #tpu.memory_space<vmem>>, vector<8x8xf32>
    %c8 = arith.constant 8 : index
    %c0_94 = arith.constant 0 : index
    %218 = vector.load %arg7[%c8, %c0_94] : memref<16x8xf32, #tpu.memory_space<vmem>>, vector<8x8xf32>
    %219 = tpu.iota {dimensions = array<i32: 0>} : vector<8x1xi32>
    %220 = tpu.iota {dimensions = array<i32: 1>} : vector<1x8xi32>
    %221 = tpu.iota {dimensions = array<i32: 1>} : vector<1x8xi32>
    %222 = tpu.iota {dimensions = array<i32: 0>} : vector<8x8xi32>
    %223 = tpu.iota {dimensions = array<i32: 1>} : vector<8x8xi32>
    %224 = arith.cmpi eq, %222, %223 : vector<8x8xi32>
    %c6_i32 = arith.constant 6 : i32
    %225 = vector.broadcast %c6_i32 : i32 to vector<8x1xi32>
    %226 = arith.cmpi eq, %219, %225 : vector<8x1xi32>
    %cst_95 = arith.constant 0.000000e+00 : f32
    %cst_96 = arith.constant -1.000000e+04 : f32
    %227 = vector.broadcast %cst_95 : f32 to vector<8x1xf32>
    %228 = vector.broadcast %cst_96 : f32 to vector<8x1xf32>
    %229 = arith.select %226, %227, %228 : vector<8x1xi1>, vector<8x1xf32>
    %230 = vector.extract_strided_slice %216 {offsets = [0, 0], sizes = [1, 8], strides = [1, 1]} : vector<8x8xf32> to vector<1x8xf32>
    %231 = vector.broadcast %229 : vector<8x1xf32> to vector<8x8xf32>
    %232 = arith.addf %231, %217 : vector<8x8xf32>
    %cst_97 = arith.constant dense<0xFF800000> : vector<8xf32>
    %233 = vector.multi_reduction <maximumf>, %232, %cst_97 [0] : vector<8x8xf32> to vector<8xf32>
    %234 = vector.shape_cast %233 : vector<8xf32> to vector<1x8xf32>
    %235 = vector.broadcast %234 : vector<1x8xf32> to vector<8x8xf32>
    %236 = arith.cmpf oeq, %232, %235 : vector<8x8xf32>
    %c8_i32 = arith.constant 8 : i32
    %237 = vector.broadcast %c8_i32 : i32 to vector<8x8xi32>
    %238 = arith.select %236, %222, %237 : vector<8x8xi1>, vector<8x8xi32>
    %cst_98 = arith.constant dense<2147483647> : vector<8xi32>
    %239 = vector.multi_reduction <minsi>, %238, %cst_98 [0] : vector<8x8xi32> to vector<8xi32>
    %240 = vector.shape_cast %239 : vector<8xi32> to vector<1x8xi32>
    %c0_99 = arith.constant 0 : index
    %c0_100 = arith.constant 0 : index
    %241 = vector.load %arg12[%c0_99, %c0_100] : memref<8x8xi32, #tpu.memory_space<vmem>>, vector<1x8xi32>
    tpu.vector_store %arg12[%c0_99, %c0_100], %240 {strides = array<i32>} : memref<8x8xi32, #tpu.memory_space<vmem>>, vector<1x8xi32>,
    %242 = arith.addf %234, %230 : vector<1x8xf32>
    %243 = vector.extract_strided_slice %216 {offsets = [1, 0], sizes = [1, 8], strides = [1, 1]} : vector<8x8xf32> to vector<1x8xf32>
    %244 = vector.broadcast %242 : vector<1x8xf32> to vector<8x8xf32>
    %245 = arith.addf %244, %218 : vector<8x8xf32>
    %cst_101 = arith.constant dense<0xFF800000> : vector<8xf32>
    %246 = vector.multi_reduction <maximumf>, %245, %cst_101 [1] : vector<8x8xf32> to vector<8xf32>
    %247 = vector.shape_cast %246 : vector<8xf32> to vector<8x1xf32>
    %248 = vector.broadcast %247 : vector<8x1xf32> to vector<8x8xf32>
    %249 = arith.cmpf oeq, %245, %248 : vector<8x8xf32>
    %c8_i32_102 = arith.constant 8 : i32
    %250 = vector.broadcast %c8_i32_102 : i32 to vector<8x8xi32>
    %251 = arith.select %249, %223, %250 : vector<8x8xi1>, vector<8x8xi32>
    %cst_103 = arith.constant dense<2147483647> : vector<8xi32>
    %252 = vector.multi_reduction <minsi>, %251, %cst_103 [1] : vector<8x8xi32> to vector<8xi32>
    %253 = vector.shape_cast %252 : vector<8xi32> to vector<8x1xi32>
    %c0_i32 = arith.constant 0 : i32
    %254 = vector.shape_cast %253 : vector<8x1xi32> to vector<8x1xi32>
    %255 = vector.broadcast %254 : vector<8x1xi32> to vector<8x8xi32>
    %256 = vector.broadcast %c0_i32 : i32 to vector<8x8xi32>
    %257 = arith.select %224, %255, %256 : vector<8x8xi1>, vector<8x8xi32>
    %cst_104 = arith.constant dense<0> : vector<8xi32>
    %258 = vector.multi_reduction <add>, %257, %cst_104 [0] : vector<8x8xi32> to vector<8xi32>
    %259 = vector.shape_cast %258 : vector<8xi32> to vector<1x8xi32>
    %c1_105 = arith.constant 1 : index
    %c0_106 = arith.constant 0 : index
    %260 = vector.load %arg12[%c1_105, %c0_106] : memref<8x8xi32, #tpu.memory_space<vmem>>, vector<1x8xi32>
    tpu.vector_store %arg12[%c1_105, %c0_106], %259 {strides = array<i32>} : memref<8x8xi32, #tpu.memory_space<vmem>>, vector<1x8xi32>,
    %cst_107 = arith.constant 0.000000e+00 : f32
    %261 = vector.shape_cast %243 : vector<1x8xf32> to vector<1x8xf32>
    %262 = vector.broadcast %261 : vector<1x8xf32> to vector<8x8xf32>
    %263 = vector.broadcast %cst_107 : f32 to vector<8x8xf32>
    %264 = arith.select %224, %262, %263 : vector<8x8xi1>, vector<8x8xf32>
    %cst_108 = arith.constant dense<0.000000e+00> : vector<8xf32>
    %265 = vector.multi_reduction <add>, %264, %cst_108 [1] : vector<8x8xf32> to vector<8xf32>
    %266 = vector.shape_cast %265 : vector<8xf32> to vector<8x1xf32>
    %267 = arith.addf %247, %266 : vector<8x1xf32>
    %268 = vector.extract_strided_slice %216 {offsets = [2, 0], sizes = [1, 8], strides = [1, 1]} : vector<8x8xf32> to vector<1x8xf32>
    %269 = vector.broadcast %267 : vector<8x1xf32> to vector<8x8xf32>
    %270 = arith.addf %269, %217 : vector<8x8xf32>
    %cst_109 = arith.constant dense<0xFF800000> : vector<8xf32>
    %271 = vector.multi_reduction <maximumf>, %270, %cst_109 [0] : vector<8x8xf32> to vector<8xf32>
    %272 = vector.shape_cast %271 : vector<8xf32> to vector<1x8xf32>
    %273 = vector.broadcast %272 : vector<1x8xf32> to vector<8x8xf32>
    %274 = arith.cmpf oeq, %270, %273 : vector<8x8xf32>
    %c8_i32_110 = arith.constant 8 : i32
    %275 = vector.broadcast %c8_i32_110 : i32 to vector<8x8xi32>
    %276 = arith.select %274, %222, %275 : vector<8x8xi1>, vector<8x8xi32>
    %cst_111 = arith.constant dense<2147483647> : vector<8xi32>
    %277 = vector.multi_reduction <minsi>, %276, %cst_111 [0] : vector<8x8xi32> to vector<8xi32>
    %278 = vector.shape_cast %277 : vector<8xi32> to vector<1x8xi32>
    %c2_112 = arith.constant 2 : index
    %c0_113 = arith.constant 0 : index
    %279 = vector.load %arg12[%c2_112, %c0_113] : memref<8x8xi32, #tpu.memory_space<vmem>>, vector<1x8xi32>
    tpu.vector_store %arg12[%c2_112, %c0_113], %278 {strides = array<i32>} : memref<8x8xi32, #tpu.memory_space<vmem>>, vector<1x8xi32>,
    %280 = arith.addf %272, %268 : vector<1x8xf32>
    %281 = vector.extract_strided_slice %216 {offsets = [3, 0], sizes = [1, 8], strides = [1, 1]} : vector<8x8xf32> to vector<1x8xf32>
    %282 = vector.broadcast %280 : vector<1x8xf32> to vector<8x8xf32>
    %283 = arith.addf %282, %218 : vector<8x8xf32>
    %cst_114 = arith.constant dense<0xFF800000> : vector<8xf32>
    %284 = vector.multi_reduction <maximumf>, %283, %cst_114 [1] : vector<8x8xf32> to vector<8xf32>
    %285 = vector.shape_cast %284 : vector<8xf32> to vector<8x1xf32>
    %286 = vector.broadcast %285 : vector<8x1xf32> to vector<8x8xf32>
    %287 = arith.cmpf oeq, %283, %286 : vector<8x8xf32>
    %c8_i32_115 = arith.constant 8 : i32
    %288 = vector.broadcast %c8_i32_115 : i32 to vector<8x8xi32>
    %289 = arith.select %287, %223, %288 : vector<8x8xi1>, vector<8x8xi32>
    %cst_116 = arith.constant dense<2147483647> : vector<8xi32>
    %290 = vector.multi_reduction <minsi>, %289, %cst_116 [1] : vector<8x8xi32> to vector<8xi32>
    %291 = vector.shape_cast %290 : vector<8xi32> to vector<8x1xi32>
    %c0_i32_117 = arith.constant 0 : i32
    %292 = vector.shape_cast %291 : vector<8x1xi32> to vector<8x1xi32>
    %293 = vector.broadcast %292 : vector<8x1xi32> to vector<8x8xi32>
    %294 = vector.broadcast %c0_i32_117 : i32 to vector<8x8xi32>
    %295 = arith.select %224, %293, %294 : vector<8x8xi1>, vector<8x8xi32>
    %cst_118 = arith.constant dense<0> : vector<8xi32>
    %296 = vector.multi_reduction <add>, %295, %cst_118 [0] : vector<8x8xi32> to vector<8xi32>
    %297 = vector.shape_cast %296 : vector<8xi32> to vector<1x8xi32>
    %c3_119 = arith.constant 3 : index
    %c0_120 = arith.constant 0 : index
    %298 = vector.load %arg12[%c3_119, %c0_120] : memref<8x8xi32, #tpu.memory_space<vmem>>, vector<1x8xi32>
    tpu.vector_store %arg12[%c3_119, %c0_120], %297 {strides = array<i32>} : memref<8x8xi32, #tpu.memory_space<vmem>>, vector<1x8xi32>,
    %cst_121 = arith.constant 0.000000e+00 : f32
    %299 = vector.shape_cast %281 : vector<1x8xf32> to vector<1x8xf32>
    %300 = vector.broadcast %299 : vector<1x8xf32> to vector<8x8xf32>
    %301 = vector.broadcast %cst_121 : f32 to vector<8x8xf32>
    %302 = arith.select %224, %300, %301 : vector<8x8xi1>, vector<8x8xf32>
    %cst_122 = arith.constant dense<0.000000e+00> : vector<8xf32>
    %303 = vector.multi_reduction <add>, %302, %cst_122 [1] : vector<8x8xf32> to vector<8xf32>
    %304 = vector.shape_cast %303 : vector<8xf32> to vector<8x1xf32>
    %305 = arith.addf %285, %304 : vector<8x1xf32>
    %306 = vector.extract_strided_slice %216 {offsets = [4, 0], sizes = [1, 8], strides = [1, 1]} : vector<8x8xf32> to vector<1x8xf32>
    %307 = vector.broadcast %305 : vector<8x1xf32> to vector<8x8xf32>
    %308 = arith.addf %307, %217 : vector<8x8xf32>
    %cst_123 = arith.constant dense<0xFF800000> : vector<8xf32>
    %309 = vector.multi_reduction <maximumf>, %308, %cst_123 [0] : vector<8x8xf32> to vector<8xf32>
    %310 = vector.shape_cast %309 : vector<8xf32> to vector<1x8xf32>
    %311 = vector.broadcast %310 : vector<1x8xf32> to vector<8x8xf32>
    %312 = arith.cmpf oeq, %308, %311 : vector<8x8xf32>
    %c8_i32_124 = arith.constant 8 : i32
    %313 = vector.broadcast %c8_i32_124 : i32 to vector<8x8xi32>
    %314 = arith.select %312, %222, %313 : vector<8x8xi1>, vector<8x8xi32>
    %cst_125 = arith.constant dense<2147483647> : vector<8xi32>
    %315 = vector.multi_reduction <minsi>, %314, %cst_125 [0] : vector<8x8xi32> to vector<8xi32>
    %316 = vector.shape_cast %315 : vector<8xi32> to vector<1x8xi32>
    %c4_126 = arith.constant 4 : index
    %c0_127 = arith.constant 0 : index
    %317 = vector.load %arg12[%c4_126, %c0_127] : memref<8x8xi32, #tpu.memory_space<vmem>>, vector<1x8xi32>
    tpu.vector_store %arg12[%c4_126, %c0_127], %316 {strides = array<i32>} : memref<8x8xi32, #tpu.memory_space<vmem>>, vector<1x8xi32>,
    %318 = arith.addf %310, %306 : vector<1x8xf32>
    %319 = vector.extract_strided_slice %216 {offsets = [5, 0], sizes = [1, 8], strides = [1, 1]} : vector<8x8xf32> to vector<1x8xf32>
    %320 = vector.broadcast %318 : vector<1x8xf32> to vector<8x8xf32>
    %321 = arith.addf %320, %218 : vector<8x8xf32>
    %cst_128 = arith.constant dense<0xFF800000> : vector<8xf32>
    %322 = vector.multi_reduction <maximumf>, %321, %cst_128 [1] : vector<8x8xf32> to vector<8xf32>
    %323 = vector.shape_cast %322 : vector<8xf32> to vector<8x1xf32>
    %324 = vector.broadcast %323 : vector<8x1xf32> to vector<8x8xf32>
    %325 = arith.cmpf oeq, %321, %324 : vector<8x8xf32>
    %c8_i32_129 = arith.constant 8 : i32
    %326 = vector.broadcast %c8_i32_129 : i32 to vector<8x8xi32>
    %327 = arith.select %325, %223, %326 : vector<8x8xi1>, vector<8x8xi32>
    %cst_130 = arith.constant dense<2147483647> : vector<8xi32>
    %328 = vector.multi_reduction <minsi>, %327, %cst_130 [1] : vector<8x8xi32> to vector<8xi32>
    %329 = vector.shape_cast %328 : vector<8xi32> to vector<8x1xi32>
    %c0_i32_131 = arith.constant 0 : i32
    %330 = vector.shape_cast %329 : vector<8x1xi32> to vector<8x1xi32>
    %331 = vector.broadcast %330 : vector<8x1xi32> to vector<8x8xi32>
    %332 = vector.broadcast %c0_i32_131 : i32 to vector<8x8xi32>
    %333 = arith.select %224, %331, %332 : vector<8x8xi1>, vector<8x8xi32>
    %cst_132 = arith.constant dense<0> : vector<8xi32>
    %334 = vector.multi_reduction <add>, %333, %cst_132 [0] : vector<8x8xi32> to vector<8xi32>
    %335 = vector.shape_cast %334 : vector<8xi32> to vector<1x8xi32>
    %c5_133 = arith.constant 5 : index
    %c0_134 = arith.constant 0 : index
    %336 = vector.load %arg12[%c5_133, %c0_134] : memref<8x8xi32, #tpu.memory_space<vmem>>, vector<1x8xi32>
    tpu.vector_store %arg12[%c5_133, %c0_134], %335 {strides = array<i32>} : memref<8x8xi32, #tpu.memory_space<vmem>>, vector<1x8xi32>,
    %cst_135 = arith.constant 0.000000e+00 : f32
    %337 = vector.shape_cast %319 : vector<1x8xf32> to vector<1x8xf32>
    %338 = vector.broadcast %337 : vector<1x8xf32> to vector<8x8xf32>
    %339 = vector.broadcast %cst_135 : f32 to vector<8x8xf32>
    %340 = arith.select %224, %338, %339 : vector<8x8xi1>, vector<8x8xf32>
    %cst_136 = arith.constant dense<0.000000e+00> : vector<8xf32>
    %341 = vector.multi_reduction <add>, %340, %cst_136 [1] : vector<8x8xf32> to vector<8xf32>
    %342 = vector.shape_cast %341 : vector<8xf32> to vector<8x1xf32>
    %343 = arith.addf %323, %342 : vector<8x1xf32>
    %344 = vector.extract_strided_slice %216 {offsets = [6, 0], sizes = [1, 8], strides = [1, 1]} : vector<8x8xf32> to vector<1x8xf32>
    %345 = vector.broadcast %343 : vector<8x1xf32> to vector<8x8xf32>
    %346 = arith.addf %345, %217 : vector<8x8xf32>
    %cst_137 = arith.constant dense<0xFF800000> : vector<8xf32>
    %347 = vector.multi_reduction <maximumf>, %346, %cst_137 [0] : vector<8x8xf32> to vector<8xf32>
    %348 = vector.shape_cast %347 : vector<8xf32> to vector<1x8xf32>
    %349 = vector.broadcast %348 : vector<1x8xf32> to vector<8x8xf32>
    %350 = arith.cmpf oeq, %346, %349 : vector<8x8xf32>
    %c8_i32_138 = arith.constant 8 : i32
    %351 = vector.broadcast %c8_i32_138 : i32 to vector<8x8xi32>
    %352 = arith.select %350, %222, %351 : vector<8x8xi1>, vector<8x8xi32>
    %cst_139 = arith.constant dense<2147483647> : vector<8xi32>
    %353 = vector.multi_reduction <minsi>, %352, %cst_139 [0] : vector<8x8xi32> to vector<8xi32>
    %354 = vector.shape_cast %353 : vector<8xi32> to vector<1x8xi32>
    %c6_140 = arith.constant 6 : index
    %c0_141 = arith.constant 0 : index
    %355 = vector.load %arg12[%c6_140, %c0_141] : memref<8x8xi32, #tpu.memory_space<vmem>>, vector<1x8xi32>
    tpu.vector_store %arg12[%c6_140, %c0_141], %354 {strides = array<i32>} : memref<8x8xi32, #tpu.memory_space<vmem>>, vector<1x8xi32>,
    %356 = arith.addf %348, %344 : vector<1x8xf32>
    %357 = vector.extract_strided_slice %216 {offsets = [7, 0], sizes = [1, 8], strides = [1, 1]} : vector<8x8xf32> to vector<1x8xf32>
    %358 = vector.broadcast %356 : vector<1x8xf32> to vector<8x8xf32>
    %359 = arith.addf %358, %218 : vector<8x8xf32>
    %cst_142 = arith.constant dense<0xFF800000> : vector<8xf32>
    %360 = vector.multi_reduction <maximumf>, %359, %cst_142 [1] : vector<8x8xf32> to vector<8xf32>
    %361 = vector.shape_cast %360 : vector<8xf32> to vector<8x1xf32>
    %362 = vector.broadcast %361 : vector<8x1xf32> to vector<8x8xf32>
    %363 = arith.cmpf oeq, %359, %362 : vector<8x8xf32>
    %c8_i32_143 = arith.constant 8 : i32
    %364 = vector.broadcast %c8_i32_143 : i32 to vector<8x8xi32>
    %365 = arith.select %363, %223, %364 : vector<8x8xi1>, vector<8x8xi32>
    %cst_144 = arith.constant dense<2147483647> : vector<8xi32>
    %366 = vector.multi_reduction <minsi>, %365, %cst_144 [1] : vector<8x8xi32> to vector<8xi32>
    %367 = vector.shape_cast %366 : vector<8xi32> to vector<8x1xi32>
    %c0_i32_145 = arith.constant 0 : i32
    %368 = vector.shape_cast %367 : vector<8x1xi32> to vector<8x1xi32>
    %369 = vector.broadcast %368 : vector<8x1xi32> to vector<8x8xi32>
    %370 = vector.broadcast %c0_i32_145 : i32 to vector<8x8xi32>
    %371 = arith.select %224, %369, %370 : vector<8x8xi1>, vector<8x8xi32>
    %cst_146 = arith.constant dense<0> : vector<8xi32>
    %372 = vector.multi_reduction <add>, %371, %cst_146 [0] : vector<8x8xi32> to vector<8xi32>
    %373 = vector.shape_cast %372 : vector<8xi32> to vector<1x8xi32>
    %c7_147 = arith.constant 7 : index
    %c0_148 = arith.constant 0 : index
    %374 = vector.load %arg12[%c7_147, %c0_148] : memref<8x8xi32, #tpu.memory_space<vmem>>, vector<1x8xi32>
    tpu.vector_store %arg12[%c7_147, %c0_148], %373 {strides = array<i32>} : memref<8x8xi32, #tpu.memory_space<vmem>>, vector<1x8xi32>,
    %cst_149 = arith.constant 0.000000e+00 : f32
    %375 = vector.shape_cast %357 : vector<1x8xf32> to vector<1x8xf32>
    %376 = vector.broadcast %375 : vector<1x8xf32> to vector<8x8xf32>
    %377 = vector.broadcast %cst_149 : f32 to vector<8x8xf32>
    %378 = arith.select %224, %376, %377 : vector<8x8xi1>, vector<8x8xf32>
    %cst_150 = arith.constant dense<0.000000e+00> : vector<8xf32>
    %379 = vector.multi_reduction <add>, %378, %cst_150 [1] : vector<8x8xf32> to vector<8xf32>
    %380 = vector.shape_cast %379 : vector<8xf32> to vector<8x1xf32>
    %381 = arith.addf %361, %380 : vector<8x1xf32>
    %382 = vector.extract_strided_slice %217 {offsets = [0, 7], sizes = [8, 1], strides = [1, 1]} : vector<8x8xf32> to vector<8x1xf32>
    %383 = arith.addf %381, %382 : vector<8x1xf32>
    %c7_i32 = arith.constant 7 : i32
    %384 = vector.broadcast %c7_i32 : i32 to vector<8x1xi32>
    %385 = arith.cmpi eq, %219, %384 : vector<8x1xi32>
    %c6_i32_151 = arith.constant 6 : i32
    %386 = vector.broadcast %c6_i32_151 : i32 to vector<8x1xi32>
    %387 = arith.cmpi eq, %219, %386 : vector<8x1xi32>
    %388 = arith.ori %385, %387 : vector<8x1xi1>
    %cst_152 = arith.constant -1.000000e+04 : f32
    %389 = vector.broadcast %cst_152 : f32 to vector<8x1xf32>
    %390 = arith.select %388, %389, %383 : vector<8x1xi1>, vector<8x1xf32>
    %cst_153 = arith.constant dense<0xFF800000> : vector<1xf32>
    %391 = vector.multi_reduction <maximumf>, %390, %cst_153 [0] : vector<8x1xf32> to vector<1xf32>
    %392 = vector.shape_cast %391 : vector<1xf32> to vector<1x1xf32>
    %393 = vector.broadcast %392 : vector<1x1xf32> to vector<8x1xf32>
    %394 = arith.cmpf oeq, %390, %393 : vector<8x1xf32>
    %c8_i32_154 = arith.constant 8 : i32
    %395 = vector.broadcast %c8_i32_154 : i32 to vector<8x1xi32>
    %396 = arith.select %394, %219, %395 : vector<8x1xi1>, vector<8x1xi32>
    %397 = vector.shape_cast %396 : vector<8x1xi32> to vector<1x8x1xi32>
    %cst_155 = arith.constant dense<2147483647> : vector<1xi32>
    %398 = vector.multi_reduction <minsi>, %397, %cst_155 [1, 2] : vector<1x8x1xi32> to vector<1xi32>
    %399 = vector.shape_cast %398 : vector<1xi32> to vector<1x1x1xi32>
    %400 = vector.extract %399[0, 0, 0] : i32 from vector<1x1x1xi32>
    %c0_156 = arith.constant 0 : index
    %c0_157 = arith.constant 0 : index
    %c0_158 = arith.constant 0 : index
    %401 = vector.load %arg8[%c0_156, %c0_157, %c0_158] : memref<1x1x1xf32, #tpu.memory_space<vmem>>, vector<1x1x1xf32>
    %402 = vector.shape_cast %401 : vector<1x1x1xf32> to vector<1x1xf32>
    %403 = vector.shape_cast %392 : vector<1x1xf32> to vector<1x1x1xf32>
    tpu.vector_store %arg8[%c0_156, %c0_157, %c0_158], %403 {strides = array<i32>} : memref<1x1x1xf32, #tpu.memory_space<vmem>>, vector<1x1x1xf32>,
    %c7_i32_159 = arith.constant 7 : i32
    %404 = vector.broadcast %c7_i32_159 : i32 to vector<1x8xi32>
    %405 = arith.cmpi eq, %221, %404 : vector<1x8xi32>
    %c0_i32_160 = arith.constant 0 : i32
    %406 = vector.broadcast %400 : i32 to vector<1x8xi32>
    %407 = vector.broadcast %c0_i32_160 : i32 to vector<1x8xi32>
    %408 = arith.select %405, %406, %407 : vector<1x8xi1>, vector<1x8xi32>
    %c7_161 = arith.constant 7 : index
    %c0_162 = arith.constant 0 : index
    %409 = vector.load %arg12[%c7_161, %c0_162] : memref<8x8xi32, #tpu.memory_space<vmem>>, vector<1x8xi32>
    %410 = vector.broadcast %400 : i32 to vector<1x8xi32>
    %411 = arith.cmpi eq, %220, %410 : vector<1x8xi32>
    %c0_i32_163 = arith.constant 0 : i32
    %412 = vector.broadcast %c0_i32_163 : i32 to vector<1x8xi32>
    %413 = arith.select %411, %409, %412 : vector<1x8xi1>, vector<1x8xi32>
    %414 = vector.shape_cast %413 : vector<1x8xi32> to vector<1x1x8xi32>
    %cst_164 = arith.constant dense<0> : vector<1xi32>
    %415 = vector.multi_reduction <add>, %414, %cst_164 [1, 2] : vector<1x1x8xi32> to vector<1xi32>
    %416 = vector.shape_cast %415 : vector<1xi32> to vector<1x1x1xi32>
    %417 = vector.extract %416[0, 0, 0] : i32 from vector<1x1x1xi32>
    %c6_i32_165 = arith.constant 6 : i32
    %418 = vector.broadcast %c6_i32_165 : i32 to vector<1x8xi32>
    %419 = arith.cmpi eq, %221, %418 : vector<1x8xi32>
    %420 = vector.broadcast %417 : i32 to vector<1x8xi32>
    %421 = arith.select %419, %420, %408 : vector<1x8xi1>, vector<1x8xi32>
    %c6_166 = arith.constant 6 : index
    %c0_167 = arith.constant 0 : index
    %422 = vector.load %arg12[%c6_166, %c0_167] : memref<8x8xi32, #tpu.memory_space<vmem>>, vector<1x8xi32>
    %423 = vector.broadcast %417 : i32 to vector<1x8xi32>
    %424 = arith.cmpi eq, %220, %423 : vector<1x8xi32>
    %c0_i32_168 = arith.constant 0 : i32
    %425 = vector.broadcast %c0_i32_168 : i32 to vector<1x8xi32>
    %426 = arith.select %424, %422, %425 : vector<1x8xi1>, vector<1x8xi32>
    %427 = vector.shape_cast %426 : vector<1x8xi32> to vector<1x1x8xi32>
    %cst_169 = arith.constant dense<0> : vector<1xi32>
    %428 = vector.multi_reduction <add>, %427, %cst_169 [1, 2] : vector<1x1x8xi32> to vector<1xi32>
    %429 = vector.shape_cast %428 : vector<1xi32> to vector<1x1x1xi32>
    %430 = vector.extract %429[0, 0, 0] : i32 from vector<1x1x1xi32>
    %c5_i32 = arith.constant 5 : i32
    %431 = vector.broadcast %c5_i32 : i32 to vector<1x8xi32>
    %432 = arith.cmpi eq, %221, %431 : vector<1x8xi32>
    %433 = vector.broadcast %430 : i32 to vector<1x8xi32>
    %434 = arith.select %432, %433, %421 : vector<1x8xi1>, vector<1x8xi32>
    %c5_170 = arith.constant 5 : index
    %c0_171 = arith.constant 0 : index
    %435 = vector.load %arg12[%c5_170, %c0_171] : memref<8x8xi32, #tpu.memory_space<vmem>>, vector<1x8xi32>
    %436 = vector.broadcast %430 : i32 to vector<1x8xi32>
    %437 = arith.cmpi eq, %220, %436 : vector<1x8xi32>
    %c0_i32_172 = arith.constant 0 : i32
    %438 = vector.broadcast %c0_i32_172 : i32 to vector<1x8xi32>
    %439 = arith.select %437, %435, %438 : vector<1x8xi1>, vector<1x8xi32>
    %440 = vector.shape_cast %439 : vector<1x8xi32> to vector<1x1x8xi32>
    %cst_173 = arith.constant dense<0> : vector<1xi32>
    %441 = vector.multi_reduction <add>, %440, %cst_173 [1, 2] : vector<1x1x8xi32> to vector<1xi32>
    %442 = vector.shape_cast %441 : vector<1xi32> to vector<1x1x1xi32>
    %443 = vector.extract %442[0, 0, 0] : i32 from vector<1x1x1xi32>
    %c4_i32 = arith.constant 4 : i32
    %444 = vector.broadcast %c4_i32 : i32 to vector<1x8xi32>
    %445 = arith.cmpi eq, %221, %444 : vector<1x8xi32>
    %446 = vector.broadcast %443 : i32 to vector<1x8xi32>
    %447 = arith.select %445, %446, %434 : vector<1x8xi1>, vector<1x8xi32>
    %c4_174 = arith.constant 4 : index
    %c0_175 = arith.constant 0 : index
    %448 = vector.load %arg12[%c4_174, %c0_175] : memref<8x8xi32, #tpu.memory_space<vmem>>, vector<1x8xi32>
    %449 = vector.broadcast %443 : i32 to vector<1x8xi32>
    %450 = arith.cmpi eq, %220, %449 : vector<1x8xi32>
    %c0_i32_176 = arith.constant 0 : i32
    %451 = vector.broadcast %c0_i32_176 : i32 to vector<1x8xi32>
    %452 = arith.select %450, %448, %451 : vector<1x8xi1>, vector<1x8xi32>
    %453 = vector.shape_cast %452 : vector<1x8xi32> to vector<1x1x8xi32>
    %cst_177 = arith.constant dense<0> : vector<1xi32>
    %454 = vector.multi_reduction <add>, %453, %cst_177 [1, 2] : vector<1x1x8xi32> to vector<1xi32>
    %455 = vector.shape_cast %454 : vector<1xi32> to vector<1x1x1xi32>
    %456 = vector.extract %455[0, 0, 0] : i32 from vector<1x1x1xi32>
    %c3_i32 = arith.constant 3 : i32
    %457 = vector.broadcast %c3_i32 : i32 to vector<1x8xi32>
    %458 = arith.cmpi eq, %221, %457 : vector<1x8xi32>
    %459 = vector.broadcast %456 : i32 to vector<1x8xi32>
    %460 = arith.select %458, %459, %447 : vector<1x8xi1>, vector<1x8xi32>
    %c3_178 = arith.constant 3 : index
    %c0_179 = arith.constant 0 : index
    %461 = vector.load %arg12[%c3_178, %c0_179] : memref<8x8xi32, #tpu.memory_space<vmem>>, vector<1x8xi32>
    %462 = vector.broadcast %456 : i32 to vector<1x8xi32>
    %463 = arith.cmpi eq, %220, %462 : vector<1x8xi32>
    %c0_i32_180 = arith.constant 0 : i32
    %464 = vector.broadcast %c0_i32_180 : i32 to vector<1x8xi32>
    %465 = arith.select %463, %461, %464 : vector<1x8xi1>, vector<1x8xi32>
    %466 = vector.shape_cast %465 : vector<1x8xi32> to vector<1x1x8xi32>
    %cst_181 = arith.constant dense<0> : vector<1xi32>
    %467 = vector.multi_reduction <add>, %466, %cst_181 [1, 2] : vector<1x1x8xi32> to vector<1xi32>
    %468 = vector.shape_cast %467 : vector<1xi32> to vector<1x1x1xi32>
    %469 = vector.extract %468[0, 0, 0] : i32 from vector<1x1x1xi32>
    %c2_i32 = arith.constant 2 : i32
    %470 = vector.broadcast %c2_i32 : i32 to vector<1x8xi32>
    %471 = arith.cmpi eq, %221, %470 : vector<1x8xi32>
    %472 = vector.broadcast %469 : i32 to vector<1x8xi32>
    %473 = arith.select %471, %472, %460 : vector<1x8xi1>, vector<1x8xi32>
    %c2_182 = arith.constant 2 : index
    %c0_183 = arith.constant 0 : index
    %474 = vector.load %arg12[%c2_182, %c0_183] : memref<8x8xi32, #tpu.memory_space<vmem>>, vector<1x8xi32>
    %475 = vector.broadcast %469 : i32 to vector<1x8xi32>
    %476 = arith.cmpi eq, %220, %475 : vector<1x8xi32>
    %c0_i32_184 = arith.constant 0 : i32
    %477 = vector.broadcast %c0_i32_184 : i32 to vector<1x8xi32>
    %478 = arith.select %476, %474, %477 : vector<1x8xi1>, vector<1x8xi32>
    %479 = vector.shape_cast %478 : vector<1x8xi32> to vector<1x1x8xi32>
    %cst_185 = arith.constant dense<0> : vector<1xi32>
    %480 = vector.multi_reduction <add>, %479, %cst_185 [1, 2] : vector<1x1x8xi32> to vector<1xi32>
    %481 = vector.shape_cast %480 : vector<1xi32> to vector<1x1x1xi32>
    %482 = vector.extract %481[0, 0, 0] : i32 from vector<1x1x1xi32>
    %c1_i32 = arith.constant 1 : i32
    %483 = vector.broadcast %c1_i32 : i32 to vector<1x8xi32>
    %484 = arith.cmpi eq, %221, %483 : vector<1x8xi32>
    %485 = vector.broadcast %482 : i32 to vector<1x8xi32>
    %486 = arith.select %484, %485, %473 : vector<1x8xi1>, vector<1x8xi32>
    %c1_186 = arith.constant 1 : index
    %c0_187 = arith.constant 0 : index
    %487 = vector.load %arg12[%c1_186, %c0_187] : memref<8x8xi32, #tpu.memory_space<vmem>>, vector<1x8xi32>
    %488 = vector.broadcast %482 : i32 to vector<1x8xi32>
    %489 = arith.cmpi eq, %220, %488 : vector<1x8xi32>
    %c0_i32_188 = arith.constant 0 : i32
    %490 = vector.broadcast %c0_i32_188 : i32 to vector<1x8xi32>
    %491 = arith.select %489, %487, %490 : vector<1x8xi1>, vector<1x8xi32>
    %492 = vector.shape_cast %491 : vector<1x8xi32> to vector<1x1x8xi32>
    %cst_189 = arith.constant dense<0> : vector<1xi32>
    %493 = vector.multi_reduction <add>, %492, %cst_189 [1, 2] : vector<1x1x8xi32> to vector<1xi32>
    %494 = vector.shape_cast %493 : vector<1xi32> to vector<1x1x1xi32>
    %495 = vector.extract %494[0, 0, 0] : i32 from vector<1x1x1xi32>
    %c0_i32_190 = arith.constant 0 : i32
    %496 = vector.broadcast %c0_i32_190 : i32 to vector<1x8xi32>
    %497 = arith.cmpi eq, %221, %496 : vector<1x8xi32>
    %498 = vector.broadcast %495 : i32 to vector<1x8xi32>
    %499 = arith.select %497, %498, %486 : vector<1x8xi1>, vector<1x8xi32>
    %c0_191 = arith.constant 0 : index
    %c0_192 = arith.constant 0 : index
    %c0_193 = arith.constant 0 : index
    %500 = vector.load %arg9[%c0_191, %c0_192, %c0_193] : memref<1x1x8xi32, #tpu.memory_space<vmem>>, vector<1x1x8xi32>
    %501 = vector.shape_cast %500 : vector<1x1x8xi32> to vector<1x8xi32>
    %502 = vector.shape_cast %499 : vector<1x8xi32> to vector<1x1x8xi32>
    tpu.vector_store %arg9[%c0_191, %c0_192, %c0_193], %502 {strides = array<i32>} : memref<1x1x8xi32, #tpu.memory_space<vmem>>, vector<1x1x8xi32>,
    return
  }
  func.func @transform_0(%arg0: i32) -> (i32, i32, i32) {
    %c0_i32 = arith.constant 0 : i32
    %c0_i32_0 = arith.constant 0 : i32
    %c0_i32_1 = arith.constant 0 : i32
    return %arg0, %c0_i32, %c0_i32_0 : i32, i32, i32
  }
  func.func @transform_1(%arg0: i32) -> (i32, i32) {
    %c0_i32 = arith.constant 0 : i32
    %c0_i32_0 = arith.constant 0 : i32
    %c0_i32_1 = arith.constant 0 : i32
    return %c0_i32, %c0_i32_0 : i32, i32
  }
  func.func @transform_2(%arg0: i32) -> (i32, i32) {
    %c0_i32 = arith.constant 0 : i32
    %c0_i32_0 = arith.constant 0 : i32
    %c0_i32_1 = arith.constant 0 : i32
    return %c0_i32, %c0_i32_0 : i32, i32
  }
  func.func @transform_3(%arg0: i32) -> (i32, i32) {
    %c0_i32 = arith.constant 0 : i32
    %c0_i32_0 = arith.constant 0 : i32
    %c0_i32_1 = arith.constant 0 : i32
    return %c0_i32, %c0_i32_0 : i32, i32
  }
  func.func @transform_4(%arg0: i32) -> (i32, i32) {
    %c0_i32 = arith.constant 0 : i32
    %c0_i32_0 = arith.constant 0 : i32
    %c0_i32_1 = arith.constant 0 : i32
    return %c0_i32, %c0_i32_0 : i32, i32
  }
  func.func @transform_5(%arg0: i32) -> (i32, i32) {
    %c0_i32 = arith.constant 0 : i32
    %c0_i32_0 = arith.constant 0 : i32
    %c0_i32_1 = arith.constant 0 : i32
    return %c0_i32, %c0_i32_0 : i32, i32
  }
  func.func @transform_6(%arg0: i32) -> (i32, i32) {
    %c0_i32 = arith.constant 0 : i32
    %c0_i32_0 = arith.constant 0 : i32
    %c0_i32_1 = arith.constant 0 : i32
    return %c0_i32, %c0_i32_0 : i32, i32
  }
  func.func @transform_7(%arg0: i32) -> (i32, i32, i32) {
    %c0_i32 = arith.constant 0 : i32
    %c0_i32_0 = arith.constant 0 : i32
    %c0_i32_1 = arith.constant 0 : i32
    return %arg0, %c0_i32, %c0_i32_0 : i32, i32, i32
  }
  func.func @transform_8(%arg0: i32) -> (i32, i32, i32) {
    %c0_i32 = arith.constant 0 : i32
    %c0_i32_0 = arith.constant 0 : i32
    %c0_i32_1 = arith.constant 0 : i32
    return %arg0, %c0_i32, %c0_i32_0 : i32, i32, i32
  }
}

</mosaic_0001>

<bundles_post_ra>
// kernel: tpu_custom_call.1
= control target key start
LH: loop header
LB: loop body
LE: loop exit
PB: predicated region body
PF: predicated region fallthrough
CT: control target
= control target key end

     0   :  { %14 = vsyncpa [#allocation6], 0  ;;  %s2271_s0 = inlined_call_operand.vmem [shape: f32[4,8,32], index: 0, kind: input, shape index: {}]   ;;  %s2272_s1 = inlined_call_operand.vmem [shape: f32[32,128], index: 1, kind: input, shape index: {}]   ;;  %s2273_s2 = inlined_call_operand.hbm [shape: f32[32,128], index: 2, kind: input, shape index: {}]   ;;  %s2274_s3 = inlined_call_operand.hbm [shape: f32[1,128], index: 3, kind: input, shape index: {}]   ;;  %s2275_s4 = inlined_call_operand.vmem [shape: f32[2,32], index: 4, kind: input, shape index: {}]   ;;  %s2276_s5 = inlined_call_operand.vmem [shape: f32[33,8], index: 5, kind: input, shape index: {}]   ;;  %s2277_s6 = inlined_call_operand.vmem [shape: f32[16,8], index: 6, kind: input, shape index: {}]   ;;  %s2278_s7 = inlined_call_operand.vmem [shape: f32[4,1,1], index: 7, kind: output, shape index: {0}]   ;;  %s2279_s8 = inlined_call_operand.hbm [shape: s32[4,1,8], index: 8, kind: output, shape index: {1}]  }
   0x1   :  { %15 = vsyncpa [#allocation9], 0 }
   0x2   :  { %16 = vsyncpa [#allocation7], 0 }
   0x3   :  { %18 = vsyncpa [#allocation7 + $0x1], 0  ;;  %s1909_s27 = smov 0   ;;  %s1911_s28 = smov 0  }
   0x4   :  { %s1913_s29 = smov 0   ;;  %s1915_s30 = smov 0  }
   0x5 LB: > { %s1930_s9 = sadd.s32 4294967295, %s1854_s30   ;;  %s1555_s10 = sadd.s32 4294967294, %s1854_s30   ;;  %s1854_s30 = sphi %s1915_s30, %s2288_s30   ;;  %s1850_s29 = sphi %s1913_s29, %s2287_s29   ;;  %s1846_s28 = sphi %s1911_s28, %s2286_s28   ;;  %s1842_s27 = sphi %s1909_s27, %s2285_s27  }
   0x6   : > { %s1934_s11 = sadd.s32 1, %s1854_s30   ;;  %s209_s12 = sadd.s32 1, %s1850_s29 }
   0x7   : > { %s206_s13 = ssub.s32 %s1854_s30, %s1934_s11  ;;  %p219_p0 = scmp.ne.s32.totalorder %s1850_s29, %s1846_s28 }
   0x8   : > { %p207_p1 = scmp.eq.s32.totalorder %s206_s13, 0  ;;  %p220_p2 = scmp.eq.s32.totalorder %s1930_s9, 3 }
   0x9   : > { %p225_p3 = scmp.ne.s32.totalorder %s1846_s28, %s1842_s27  ;;  %p226_p4 = scmp.eq.s32.totalorder %s1555_s10, 3 }
   0xa   : > { %s1945_s14 = scalar_select %p207_p1, %s1850_s29, %s209_s12  }
   0xb   : > { %p1947_p5 = por %p220_p2, %p219_p0  ;;  %p1951_p6 = por %p226_p4, %p225_p3 }
   0xc   : > { %p1556_p7 = scmp.ge.s32.totalorder %s1854_s30, 1  ;;  %p233_p8 = scmp.lt.s32.totalorder %s1854_s30, 5 }
   0xd   : > { %p1629_p9 = scmp.eq.s32.totalorder %s1930_s9, 0  ;;  %s247_s20 = sshll.u32 %s2273_s2, 4  ;;  %s248_s20 = int_to_ptr.hbm [resolvable:$true] %s247_s20 }
   0xe   : > { %p1958_p10 = pnand %p1556_p7, %p233_p8  ;;  %s1856_s21 = smov [#allocation5]  }
   0xf   : > { %s249_s22 = sshll.u32 %s1856_s21, 4  ;;  %s262_s25 = sshll.u32 %s2274_s3, 4  ;;  %s250_s22 = int_to_ptr.vmem [resolvable:$true] %s249_s22  ;;  %s263_s25 = int_to_ptr.hbm [resolvable:$true] %s262_s25 }
  0x10   : > { %p1618_p11 = pneg %p1958_p10  ;;  %s1857_s26 = smov 128  }
  0x11   : > { %s1858_s10 = smov 8   ;;  %s1859_s12 = smov [#allocation8]  }
  0x12   : > { %p1619_p12 = pnand %p1629_p9, %p1618_p11  ;;  %s264_s13 = sshll.u32 %s1859_s12, 4  ;;  %s265_s13 = int_to_ptr.vmem [resolvable:$true] %s264_s13 }
  0x13   : > { %293 = sbr.rel (%p1958_p10) target bundleno = 7231 (0x1c3f), region = 48 }
  0x14   : > { %1621 = dma.hbm_to_vmem [thread:$0]  (!%p1619_p12), %s248_s20, 512, %s250_s22, [#allocation6], %s1857_s26, %s1857_s26, %s1858_s10  }
  0x15   : > { %1624 = dma.hbm_to_vmem [thread:$0]  (!%p1619_p12), %s263_s25, 16, %s265_s13, [#allocation9]  }
  0x18   : > { %1829 = dma.done.wait (%p1629_p9), [#allocation6], 512  }
  0x19   : > { %1831 = vsyncadd (%p1629_p9), [#allocation6], 4294966784 }
  0x1a   : > { %1833 = dma.done.wait (%p1629_p9), [#allocation9], 16  }
  0x1b   : > { %1835 = vsyncadd (%p1629_p9), [#allocation9], 4294967280  ;;  %p334_p13 = scmp.lt.s32.totalorder %s1930_s9, 3  ;;  %v345_v0 = vld [vmem:[%s2272_s1 + $0x18] sm:$0xff]  ;;  %v344_v1 = vld [vmem:[%s2272_s1 + $0x10] sm:$0xff]  ;;  %vm350_vm0 = vcmask 261120  }
  0x1c   : > { %366 = vmatpush.msra.mxu0 %v345_v0  ;;  %v378_v2 = vld [vmem:[#allocation5 + $0x18] sm:$0xff]  ;;  %v343_v3 = vld [vmem:[%s2272_s1 + $0x8] sm:$0xff]  ;;  %v376_v5 = vld [vmem:[#allocation5 + $0x8] sm:$0xff]  ;;  %s1860_s20 = smov 32   ;;  %s1861_s23 = smov 64   ;;  %vm452_vm5 = vcmask 122880  }
  0x1d   : > { %s1984_s18 = scalar_select %p334_p13, %s1930_s9, 3  ;;  %397 = vmatpush.msra.mxu1 %v378_v2  ;;  %v377_v4 = vld [vmem:[#allocation5 + $0x10] sm:$0xff]  ;;  %471 = vmatpush.msra.mxu2 %v378_v2  ;;  %v342_v6 = vld [vmem:[%s2272_s1] sm:$0xff]  ;;  %v375_v8 = vld [vmem:[#allocation5] sm:$0xff]  ;;  %vm454_vm6 = vcmask 254080  }
  0x1e   : > { %367 = vmatpush.msra.mxu0 %v344_v1  ;;  %539 = vmatpush.msra.mxu3 %v378_v2  ;;  %v379_v9 = vld [vmem:[%s2275_s4] sm:$0x1]  ;;  %v1674_v10 = vld [vmem:[#allocation8] ss:$0 sm:$0xff]  ;;  %v380_v31 = vld [vmem:[%s2275_s4 + $0x1] sm:$0x1] }
  0x1f   : > { %s1563_s17 = sshll.u32 %s1984_s18, 3  ;;  %398 = vmatpush.msra.mxu1 %v377_v4  ;;  %472 = vmatpush.msra.mxu2 %v377_v4 }
  0x20   : > { %s337_s10 = scalar_lea.vmem %s2271_s0, %s1563_s17  ;;  %368 = vmatpush.msra.mxu0 %v343_v3  ;;  %540 = vmatpush.msra.mxu3 %v377_v4 }
  0x21   : > { %v341_v7 = vld [vmem:[%s337_s10] sm:$0xff]  ;;  %399 = vmatpush.msra.mxu1 %v376_v5  ;;  %473 = vmatpush.msra.mxu2 %v376_v5 }
  0x22   : > { %369 = vmatpush.msra.mxu0 %v342_v6  ;;  %541 = vmatpush.msra.mxu3 %v376_v5 }
  0x23   : > { %1564 = vmatmul.msk.f32.vlgmr.msra.gmra.mxu0 %vm350_vm0, %v341_v7  ;;  %400 = vmatpush.msra.mxu1 %v375_v8 }
  0x24   : > { %1565 = vmatmul.msk.f32.vlgmr.msra.gmra.mxu1 %vm350_vm0, %v379_v9  ;;  %474 = vmatpush.msra.mxu2 %v375_v8 }
  0x25   : > { %542 = vmatpush.msra.mxu3 %v375_v8  ;;  %607 = vmatpush.msrb.mxu0 %v378_v2 }
  0x26   : > { %675 = vmatpush.msrb.mxu1 %v378_v2  ;;  %743 = vmatpush.msrb.mxu2 %v378_v2 }
  0x27   : > { %608 = vmatpush.msrb.mxu0 %v377_v4  ;;  %811 = vmatpush.msrb.mxu3 %v378_v2 }
  0x28   : > { %676 = vmatpush.msrb.mxu1 %v377_v4  ;;  %744 = vmatpush.msrb.mxu2 %v377_v4 }
  0x29   : > { %609 = vmatpush.msrb.mxu0 %v376_v5  ;;  %812 = vmatpush.msrb.mxu3 %v377_v4 }
  0x2a   : > { %677 = vmatpush.msrb.mxu1 %v376_v5  ;;  %745 = vmatpush.msrb.mxu2 %v376_v5 }
  0x2b   : > { %610 = vmatpush.msrb.mxu0 %v375_v8  ;;  %813 = vmatpush.msrb.mxu3 %v376_v5 }
  0x2c   : > { %678 = vmatpush.msrb.mxu1 %v375_v8  ;;  %746 = vmatpush.msrb.mxu2 %v375_v8 }
  0x2d   : > { %814 = vmatpush.msrb.mxu3 %v375_v8  ;;  %879 = vmatpush.msra.mxu0 %v378_v2 }
  0x2f   : > { %880 = vmatpush.msra.mxu0 %v377_v4 }
  0x31   : > { %881 = vmatpush.msra.mxu0 %v376_v5 }
  0x33   : > { %882 = vmatpush.msra.mxu0 %v375_v8 }
  0xa0   : > { %v371_v11 = vpop.f32.mrf.mxu0 }
  0xa1   : > { %v372_v12 = vadd.f32 %v1674_v10, %v371_v11  ;;  %v402_v13 = vpop.f32.mrf.mxu1 }
  0xa3   : > { %374 = vst [vmem:[#allocation2] sm:$0xff] %v372_v12 }
  0xaa   : > { %v381_v14 = vld [vmem:[#allocation2] sm:$0x1]  ;;  %v456_v42 = vld [vmem:[#allocation2 + $0x1] sm:$0x1]  ;;  %v524_v5 = vld [vmem:[#allocation2 + $0x2] sm:$0x1] }
  0xab   : > { %v405_v15 = vadd.f32 %v402_v13, %v381_v14 }
  0xad   : > { %v1566_v16 = vmul.f32 -1.442695, %v405_v15 }
  0xaf   : > { %1676 = vpow2.f32 %v1566_v16 }
  0xb5   : > { %v1677_v17 = vpop.eup %1676 }
  0xb6   : > { %v409_v18 = vadd.f32 1.0, %v1677_v17 }
  0xb8   : > { %1678 = vrcp.f32 %v409_v18  ;;  %v421_v22 = vand.u32 2147483648, %v409_v18  ;;  %v419_v24 = vand.u32 2147483647, %v409_v18  ;;  %vm415_vm2 = vweird.f32 %v409_v18 }
  0xba   : > { %v422_v26 = vor.u32 1.1754944e-38, %v421_v22  ;;  %vm420_vm4 = vcmp.eq.f32.partialorder %v419_v24, 8.507059e+37 }
  0xbe   : > { %v1679_v19 = vpop.eup %1678 }
  0xbf   : > { %v411_v20 = vmul.f32 %v1679_v19, %v409_v18  ;;  %vm416_vm1 = vweird.f32 %v1679_v19 }
  0xc0   : > { %vm417_vm3 = vmor %vm415_vm2, %vm416_vm1 }
  0xc1   : > { %v412_v21 = vsub.f32 1.0, %v411_v20 }
  0xc3   : > { %v413_v23 = vmul.f32 %v1679_v19, %v412_v21 }
  0xc5   : > { %v414_v25 = vadd.f32 %v1679_v19, %v413_v23 }
  0xc7   : > { %v418_v27 = vsel %vm417_vm3, %v1679_v19, %v414_v25 }
  0xc8   : > { %v423_v28 = vsel %vm420_vm4, %v422_v26, %v418_v27 }
  0xc9   : > { %v425_v29 = vmul.f32 2.0, %v423_v28 }
  0xcb   : > { %v1567_v30 = vadd.f32 -1.0, %v425_v29 }
  0xcd   : > { %433 = vrot.lane.b32.xlu0 %v1567_v30, %s1860_s20 }
  0xd5   : > { %428 = vrot.lane.b32.xlu0 %v380_v31, %s1860_s20 }
 0x13f   : > { %v434_v32 = vpop.permute.xlu0 %433 }
 0x140   : > { %v436_v33 = vmul.f32 %v434_v32, %v423_v28  ;;  %v592_v32 = vld [vmem:[#allocation2 + $0x3] sm:$0x1] }
 0x142   : > { %438 = vrot.lane.b32.xlu1 %v436_v33, %s1860_s20 }
 0x147   : > { %v429_v34 = vpop.permute.xlu0 %428 }
 0x148   : > { %v431_v35 = vmul.f32 %v429_v34, %v423_v28 }
 0x1b4   : > { %v439_v36 = vpop.permute.xlu1 %438 }
 0x1b5   : > { %v441_v37 = vadd.f32 %v439_v36, %v431_v35 }
 0x1b7   : > { %1680 = vtanh.f32 %v441_v37 }
 0x1bd   : > { %v1681_v38 = vpop.eup %1680 }
 0x1be   : > { %444 = vrot.lane.b32.xlu1 %v1681_v38, %s1860_s20 }
 0x230   : > { %v445_v39 = vpop.permute.xlu1 %444 }
 0x231   : > { %v447_v40 = vmul.f32 %v445_v39, %v423_v28 }
 0x233   : > { %449 = vrot.lane.b32.xlu2 %v447_v40, %s1861_s23 }
 0x28d   : > { %v450_v41 = vpop.permute.xlu2 %449 }
 0x28e   : > { %453 = vst.msk [vmem:[#allocation3] sm:$0x1] %vm452_vm5, %v450_v41  ;;  %1568 = vmatmul.msk.f32.vlgmr.msra.gmra.mxu2 %vm350_vm0, %v450_v41 }
 0x28f   : > { %455 = vst.msk [vmem:[#allocation3 + $0x7] sm:$0x1] %vm454_vm6, %v450_v41 }
 0x311   : > { %v476_v43 = vpop.f32.mrf.mxu2 }
 0x312   : > { %v479_v44 = vadd.f32 %v476_v43, %v456_v42 }
 0x314   : > { %v1569_v45 = vmul.f32 -1.442695, %v479_v44 }
 0x316   : > { %1682 = vpow2.f32 %v1569_v45 }
 0x31c   : > { %v1683_v46 = vpop.eup %1682 }
 0x31d   : > { %v483_v47 = vadd.f32 1.0, %v1683_v46 }
 0x31f   : > { %1684 = vrcp.f32 %v483_v47  ;;  %v495_v51 = vand.u32 2147483648, %v483_v47  ;;  %v493_v53 = vand.u32 2147483647, %v483_v47  ;;  %vm489_vm8 = vweird.f32 %v483_v47 }
 0x321   : > { %v496_v55 = vor.u32 1.1754944e-38, %v495_v51  ;;  %vm494_vm10 = vcmp.eq.f32.partialorder %v493_v53, 8.507059e+37 }
 0x325   : > { %v1685_v48 = vpop.eup %1684 }
 0x326   : > { %v485_v49 = vmul.f32 %v1685_v48, %v483_v47  ;;  %vm490_vm7 = vweird.f32 %v1685_v48 }
 0x327   : > { %vm491_vm9 = vmor %vm489_vm8, %vm490_vm7 }
 0x328   : > { %v486_v50 = vsub.f32 1.0, %v485_v49 }
 0x32a   : > { %v487_v52 = vmul.f32 %v1685_v48, %v486_v50 }
 0x32c   : > { %v488_v54 = vadd.f32 %v1685_v48, %v487_v52 }
 0x32e   : > { %v492_v56 = vsel %vm491_vm9, %v1685_v48, %v488_v54 }
 0x32f   : > { %v497_v57 = vsel %vm494_vm10, %v496_v55, %v492_v56 }
 0x330   : > { %v499_v58 = vmul.f32 2.0, %v497_v57  ;;  %v501_v62 = vmul.f32 %v497_v57, %v441_v37 }
 0x332   : > { %v1570_v59 = vadd.f32 -1.0, %v499_v58 }
 0x334   : > { %503 = vrot.lane.b32.xlu2 %v1570_v59, %s1860_s20  ;;  %v660_v59 = vld [vmem:[#allocation2 + $0x4] sm:$0x1] }
 0x38e   : > { %v504_v60 = vpop.permute.xlu2 %503 }
 0x38f   : > { %v506_v61 = vmul.f32 %v504_v60, %v497_v57 }
 0x391   : > { %508 = vrot.lane.b32.xlu0 %v506_v61, %s1860_s20 }
 0x403   : > { %v509_v63 = vpop.permute.xlu0 %508 }
 0x404   : > { %v511_v0 = vadd.f32 %v509_v63, %v501_v62 }
 0x406   : > { %1686 = vtanh.f32 %v511_v0 }
 0x40c   : > { %v1687_v1 = vpop.eup %1686 }
 0x40d   : > { %514 = vrot.lane.b32.xlu1 %v1687_v1, %s1860_s20 }
 0x47f   : > { %v515_v2 = vpop.permute.xlu1 %514 }
 0x480   : > { %v517_v3 = vmul.f32 %v515_v2, %v497_v57 }
 0x482   : > { %519 = vrot.lane.b32.xlu2 %v517_v3, %s1861_s23 }
 0x4dc   : > { %v520_v4 = vpop.permute.xlu2 %519 }
 0x4dd   : > { %522 = vst.msk [vmem:[#allocation3 + $0x1] sm:$0x1] %vm452_vm5, %v520_v4  ;;  %1571 = vmatmul.msk.f32.vlgmr.msra.gmra.mxu3 %vm350_vm0, %v520_v4 }
 0x4de   : > { %523 = vst.msk [vmem:[#allocation3 + $0x6] sm:$0x1] %vm454_vm6, %v520_v4 }
 0x560   : > { %v544_v6 = vpop.f32.mrf.mxu3 }
 0x561   : > { %v547_v7 = vadd.f32 %v544_v6, %v524_v5 }
 0x563   : > { %v1572_v8 = vmul.f32 -1.442695, %v547_v7 }
 0x565   : > { %1688 = vpow2.f32 %v1572_v8 }
 0x56b   : > { %v1689_v9 = vpop.eup %1688 }
 0x56c   : > { %v551_v10 = vadd.f32 1.0, %v1689_v9 }
 0x56e   : > { %1690 = vrcp.f32 %v551_v10  ;;  %v563_v14 = vand.u32 2147483648, %v551_v10  ;;  %v561_v16 = vand.u32 2147483647, %v551_v10  ;;  %vm557_vm12 = vweird.f32 %v551_v10 }
 0x570   : > { %v564_v18 = vor.u32 1.1754944e-38, %v563_v14  ;;  %vm562_vm14 = vcmp.eq.f32.partialorder %v561_v16, 8.507059e+37 }
 0x574   : > { %v1691_v11 = vpop.eup %1690 }
 0x575   : > { %v553_v12 = vmul.f32 %v1691_v11, %v551_v10  ;;  %vm558_vm11 = vweird.f32 %v1691_v11 }
 0x576   : > { %vm559_vm13 = vmor %vm557_vm12, %vm558_vm11 }
 0x577   : > { %v554_v13 = vsub.f32 1.0, %v553_v12 }
 0x579   : > { %v555_v15 = vmul.f32 %v1691_v11, %v554_v13 }
 0x57b   : > { %v556_v17 = vadd.f32 %v1691_v11, %v555_v15 }
 0x57d   : > { %v560_v19 = vsel %vm559_vm13, %v1691_v11, %v556_v17 }
 0x57e   : > { %v565_v20 = vsel %vm562_vm14, %v564_v18, %v560_v19 }
 0x57f   : > { %v567_v21 = vmul.f32 2.0, %v565_v20  ;;  %v569_v25 = vmul.f32 %v565_v20, %v511_v0 }
 0x581   : > { %v1573_v22 = vadd.f32 -1.0, %v567_v21 }
 0x583   : > { %571 = vrot.lane.b32.xlu0 %v1573_v22, %s1860_s20  ;;  %v728_v22 = vld [vmem:[#allocation2 + $0x5] sm:$0x1] }
 0x5f5   : > { %v572_v23 = vpop.permute.xlu0 %571 }
 0x5f6   : > { %v574_v24 = vmul.f32 %v572_v23, %v565_v20 }
 0x5f8   : > { %576 = vrot.lane.b32.xlu1 %v574_v24, %s1860_s20 }
 0x66a   : > { %v577_v26 = vpop.permute.xlu1 %576 }
 0x66b   : > { %v579_v27 = vadd.f32 %v577_v26, %v569_v25 }
 0x66d   : > { %1692 = vtanh.f32 %v579_v27 }
 0x673   : > { %v1693_v28 = vpop.eup %1692 }
 0x674   : > { %582 = vrot.lane.b32.xlu2 %v1693_v28, %s1860_s20 }
 0x6ce   : > { %v583_v29 = vpop.permute.xlu2 %582 }
 0x6cf   : > { %v585_v30 = vmul.f32 %v583_v29, %v565_v20 }
 0x6d1   : > { %587 = vrot.lane.b32.xlu0 %v585_v30, %s1861_s23 }
 0x743   : > { %v588_v31 = vpop.permute.xlu0 %587 }
 0x744   : > { %590 = vst.msk [vmem:[#allocation3 + $0x2] sm:$0x1] %vm452_vm5, %v588_v31  ;;  %1574 = vmatmul.msk.f32.vlgmr.msrb.gmra.mxu0 %vm350_vm0, %v588_v31 }
 0x745   : > { %591 = vst.msk [vmem:[#allocation3 + $0x5] sm:$0x1] %vm454_vm6, %v588_v31 }
 0x7c1   : > { %v612_v33 = vpop.f32.mrf.mxu0 }
 0x7c2   : > { %v615_v34 = vadd.f32 %v612_v33, %v592_v32 }
 0x7c4   : > { %v1575_v35 = vmul.f32 -1.442695, %v615_v34 }
 0x7c6   : > { %1694 = vpow2.f32 %v1575_v35 }
 0x7cc   : > { %v1695_v36 = vpop.eup %1694 }
 0x7cd   : > { %v619_v37 = vadd.f32 1.0, %v1695_v36 }
 0x7cf   : > { %1696 = vrcp.f32 %v619_v37  ;;  %v631_v41 = vand.u32 2147483648, %v619_v37  ;;  %v629_v43 = vand.u32 2147483647, %v619_v37  ;;  %vm625_vm1 = vweird.f32 %v619_v37 }
 0x7d1   : > { %v632_v45 = vor.u32 1.1754944e-38, %v631_v41  ;;  %vm630_vm3 = vcmp.eq.f32.partialorder %v629_v43, 8.507059e+37 }
 0x7d5   : > { %v1697_v38 = vpop.eup %1696 }
 0x7d6   : > { %v621_v39 = vmul.f32 %v1697_v38, %v619_v37  ;;  %vm626_vm15 = vweird.f32 %v1697_v38 }
 0x7d7   : > { %vm627_vm2 = vmor %vm625_vm1, %vm626_vm15 }
 0x7d8   : > { %v622_v40 = vsub.f32 1.0, %v621_v39 }
 0x7da   : > { %v623_v42 = vmul.f32 %v1697_v38, %v622_v40 }
 0x7dc   : > { %v624_v44 = vadd.f32 %v1697_v38, %v623_v42 }
 0x7de   : > { %v628_v46 = vsel %vm627_vm2, %v1697_v38, %v624_v44 }
 0x7df   : > { %v633_v47 = vsel %vm630_vm3, %v632_v45, %v628_v46 }
 0x7e0   : > { %v635_v48 = vmul.f32 2.0, %v633_v47  ;;  %v637_v52 = vmul.f32 %v633_v47, %v579_v27 }
 0x7e2   : > { %v1576_v49 = vadd.f32 -1.0, %v635_v48 }
 0x7e4   : > { %639 = vrot.lane.b32.xlu1 %v1576_v49, %s1860_s20  ;;  %v796_v49 = vld [vmem:[#allocation2 + $0x6] sm:$0x1] }
 0x856   : > { %v640_v50 = vpop.permute.xlu1 %639 }
 0x857   : > { %v642_v51 = vmul.f32 %v640_v50, %v633_v47 }
 0x859   : > { %644 = vrot.lane.b32.xlu2 %v642_v51, %s1860_s20 }
 0x8b3   : > { %v645_v53 = vpop.permute.xlu2 %644 }
 0x8b4   : > { %v647_v54 = vadd.f32 %v645_v53, %v637_v52 }
 0x8b6   : > { %1698 = vtanh.f32 %v647_v54 }
 0x8bc   : > { %v1699_v55 = vpop.eup %1698 }
 0x8bd   : > { %650 = vrot.lane.b32.xlu0 %v1699_v55, %s1860_s20 }
 0x92f   : > { %v651_v56 = vpop.permute.xlu0 %650 }
 0x930   : > { %v653_v57 = vmul.f32 %v651_v56, %v633_v47 }
 0x932   : > { %655 = vrot.lane.b32.xlu1 %v653_v57, %s1861_s23 }
 0x9a4   : > { %v656_v58 = vpop.permute.xlu1 %655 }
 0x9a5   : > { %658 = vst.msk [vmem:[#allocation3 + $0x3] sm:$0x1] %vm452_vm5, %v656_v58  ;;  %1577 = vmatmul.msk.f32.vlgmr.msrb.gmra.mxu1 %vm350_vm0, %v656_v58 }
 0x9a6   : > { %659 = vst.msk [vmem:[#allocation3 + $0x4] sm:$0x1] %vm454_vm6, %v656_v58 }
 0xa22   : > { %v680_v60 = vpop.f32.mrf.mxu1 }
 0xa23   : > { %v683_v61 = vadd.f32 %v680_v60, %v660_v59 }
 0xa25   : > { %v1578_v62 = vmul.f32 -1.442695, %v683_v61 }
 0xa27   : > { %1700 = vpow2.f32 %v1578_v62 }
 0xa2d   : > { %v1701_v63 = vpop.eup %1700 }
 0xa2e   : > { %v687_v0 = vadd.f32 1.0, %v1701_v63 }
 0xa30   : > { %1702 = vrcp.f32 %v687_v0  ;;  %v699_v4 = vand.u32 2147483648, %v687_v0  ;;  %v697_v6 = vand.u32 2147483647, %v687_v0  ;;  %vm693_vm7 = vweird.f32 %v687_v0 }
 0xa32   : > { %v700_v8 = vor.u32 1.1754944e-38, %v699_v4  ;;  %vm698_vm9 = vcmp.eq.f32.partialorder %v697_v6, 8.507059e+37 }
 0xa36   : > { %v1703_v1 = vpop.eup %1702 }
 0xa37   : > { %v689_v2 = vmul.f32 %v1703_v1, %v687_v0  ;;  %vm694_vm4 = vweird.f32 %v1703_v1 }
 0xa38   : > { %vm695_vm8 = vmor %vm693_vm7, %vm694_vm4 }
 0xa39   : > { %v690_v3 = vsub.f32 1.0, %v689_v2 }
 0xa3b   : > { %v691_v5 = vmul.f32 %v1703_v1, %v690_v3 }
 0xa3d   : > { %v692_v7 = vadd.f32 %v1703_v1, %v691_v5 }
 0xa3f   : > { %v696_v9 = vsel %vm695_vm8, %v1703_v1, %v692_v7 }
 0xa40   : > { %v701_v10 = vsel %vm698_vm9, %v700_v8, %v696_v9 }
 0xa41   : > { %v703_v11 = vmul.f32 2.0, %v701_v10  ;;  %v705_v15 = vmul.f32 %v701_v10, %v647_v54 }
 0xa43   : > { %v1579_v12 = vadd.f32 -1.0, %v703_v11 }
 0xa45   : > { %707 = vrot.lane.b32.xlu2 %v1579_v12, %s1860_s20  ;;  %v864_v12 = vld [vmem:[#allocation2 + $0x7] sm:$0x1] }
 0xa9f   : > { %v708_v13 = vpop.permute.xlu2 %707 }
 0xaa0   : > { %v710_v14 = vmul.f32 %v708_v13, %v701_v10 }
 0xaa2   : > { %712 = vrot.lane.b32.xlu0 %v710_v14, %s1860_s20 }
 0xb14   : > { %v713_v16 = vpop.permute.xlu0 %712 }
 0xb15   : > { %v715_v17 = vadd.f32 %v713_v16, %v705_v15 }
 0xb17   : > { %1704 = vtanh.f32 %v715_v17 }
 0xb1d   : > { %v1705_v18 = vpop.eup %1704 }
 0xb1e   : > { %718 = vrot.lane.b32.xlu1 %v1705_v18, %s1860_s20 }
 0xb90   : > { %v719_v19 = vpop.permute.xlu1 %718 }
 0xb91   : > { %v721_v20 = vmul.f32 %v719_v19, %v701_v10 }
 0xb93   : > { %723 = vrot.lane.b32.xlu2 %v721_v20, %s1861_s23 }
 0xbed   : > { %v724_v21 = vpop.permute.xlu2 %723 }
 0xbee   : > { %726 = vst.msk [vmem:[#allocation3 + $0x4] sm:$0x1] %vm452_vm5, %v724_v21  ;;  %1580 = vmatmul.msk.f32.vlgmr.msrb.gmra.mxu2 %vm350_vm0, %v724_v21 }
 0xbef   : > { %727 = vst.msk [vmem:[#allocation3 + $0x3] sm:$0x1] %vm454_vm6, %v724_v21 }
 0xc71   : > { %v748_v23 = vpop.f32.mrf.mxu2 }
 0xc72   : > { %v751_v24 = vadd.f32 %v748_v23, %v728_v22 }
 0xc74   : > { %v1581_v25 = vmul.f32 -1.442695, %v751_v24 }
 0xc76   : > { %1706 = vpow2.f32 %v1581_v25 }
 0xc7c   : > { %v1707_v26 = vpop.eup %1706 }
 0xc7d   : > { %v755_v27 = vadd.f32 1.0, %v1707_v26 }
 0xc7f   : > { %1708 = vrcp.f32 %v755_v27  ;;  %v767_v31 = vand.u32 2147483648, %v755_v27  ;;  %v765_v33 = vand.u32 2147483647, %v755_v27  ;;  %vm761_vm11 = vweird.f32 %v755_v27 }
 0xc81   : > { %v768_v35 = vor.u32 1.1754944e-38, %v767_v31  ;;  %vm766_vm13 = vcmp.eq.f32.partialorder %v765_v33, 8.507059e+37 }
 0xc85   : > { %v1709_v28 = vpop.eup %1708 }
 0xc86   : > { %v757_v29 = vmul.f32 %v1709_v28, %v755_v27  ;;  %vm762_vm10 = vweird.f32 %v1709_v28 }
 0xc87   : > { %vm763_vm12 = vmor %vm761_vm11, %vm762_vm10 }
 0xc88   : > { %v758_v30 = vsub.f32 1.0, %v757_v29 }
 0xc8a   : > { %v759_v32 = vmul.f32 %v1709_v28, %v758_v30 }
 0xc8c   : > { %v760_v34 = vadd.f32 %v1709_v28, %v759_v32 }
 0xc8e   : > { %v764_v36 = vsel %vm763_vm12, %v1709_v28, %v760_v34 }
 0xc8f   : > { %v769_v37 = vsel %vm766_vm13, %v768_v35, %v764_v36 }
 0xc90   : > { %v771_v38 = vmul.f32 2.0, %v769_v37  ;;  %v773_v42 = vmul.f32 %v769_v37, %v715_v17 }
 0xc92   : > { %v1582_v39 = vadd.f32 -1.0, %v771_v38  ;;  %v936_v38 = vld [vmem:[%s2276_s5 + $0x18] sm:$0xff] }
 0xc93   : > { %954 = vmatpush.msra.mxu1 %v936_v38 }
 0xc94   : > { %775 = vrot.lane.b32.xlu0 %v1582_v39, %s1860_s20  ;;  %v935_v39 = vld [vmem:[%s2276_s5 + $0x10] sm:$0xff] }
 0xc95   : > { %955 = vmatpush.msra.mxu1 %v935_v39 }
 0xd06   : > { %v776_v40 = vpop.permute.xlu0 %775 }
 0xd07   : > { %v778_v41 = vmul.f32 %v776_v40, %v769_v37  ;;  %v934_v40 = vld [vmem:[%s2276_s5 + $0x8] sm:$0xff] }
 0xd08   : > { %956 = vmatpush.msra.mxu1 %v934_v40 }
 0xd09   : > { %780 = vrot.lane.b32.xlu1 %v778_v41, %s1860_s20  ;;  %v933_v41 = vld [vmem:[%s2276_s5] sm:$0xff] }
 0xd0a   : > { %957 = vmatpush.msra.mxu1 %v933_v41 }
 0xd7b   : > { %v781_v43 = vpop.permute.xlu1 %780 }
 0xd7c   : > { %v783_v44 = vadd.f32 %v781_v43, %v773_v42 }
 0xd7e   : > { %1710 = vtanh.f32 %v783_v44 }
 0xd84   : > { %v1711_v45 = vpop.eup %1710 }
 0xd85   : > { %786 = vrot.lane.b32.xlu2 %v1711_v45, %s1860_s20 }
 0xddf   : > { %v787_v46 = vpop.permute.xlu2 %786 }
 0xde0   : > { %v789_v47 = vmul.f32 %v787_v46, %v769_v37  ;;  %v2085_v46 = vld [vmem:[%s2277_s6] sm:$0xff] }
 0xde2   : > { %791 = vrot.lane.b32.xlu0 %v789_v47, %s1861_s23  ;;  %v1862_v47 = vmov -10000.0  }
 0xe54   : > { %v792_v48 = vpop.permute.xlu0 %791 }
 0xe55   : > { %794 = vst.msk [vmem:[#allocation3 + $0x5] sm:$0x1] %vm452_vm5, %v792_v48  ;;  %1583 = vmatmul.msk.f32.vlgmr.msrb.gmra.mxu3 %vm350_vm0, %v792_v48 }
 0xe56   : > { %795 = vst.msk [vmem:[#allocation3 + $0x2] sm:$0x1] %vm454_vm6, %v792_v48 }
 0xed8   : > { %v816_v50 = vpop.f32.mrf.mxu3 }
 0xed9   : > { %v819_v51 = vadd.f32 %v816_v50, %v796_v49 }
 0xedb   : > { %v1584_v52 = vmul.f32 -1.442695, %v819_v51 }
 0xedd   : > { %1712 = vpow2.f32 %v1584_v52 }
 0xee3   : > { %v1713_v53 = vpop.eup %1712 }
 0xee4   : > { %v823_v54 = vadd.f32 1.0, %v1713_v53 }
 0xee6   : > { %1714 = vrcp.f32 %v823_v54  ;;  %v835_v58 = vand.u32 2147483648, %v823_v54  ;;  %v833_v60 = vand.u32 2147483647, %v823_v54  ;;  %vm829_vm15 = vweird.f32 %v823_v54 }
 0xee8   : > { %v836_v62 = vor.u32 1.1754944e-38, %v835_v58  ;;  %vm834_vm2 = vcmp.eq.f32.partialorder %v833_v60, 8.507059e+37 }
 0xeec   : > { %v1715_v55 = vpop.eup %1714 }
 0xeed   : > { %v825_v56 = vmul.f32 %v1715_v55, %v823_v54  ;;  %vm830_vm14 = vweird.f32 %v1715_v55 }
 0xeee   : > { %vm831_vm1 = vmor %vm829_vm15, %vm830_vm14 }
 0xeef   : > { %v826_v57 = vsub.f32 1.0, %v825_v56 }
 0xef1   : > { %v827_v59 = vmul.f32 %v1715_v55, %v826_v57  ;;  %v1675_v57 = vld [vmem:[%s2276_s5 + $0x20] ss:$0 sm:$0xff] }
 0xef3   : > { %v828_v61 = vadd.f32 %v1715_v55, %v827_v59 }
 0xef5   : > { %v832_v63 = vsel %vm831_vm1, %v1715_v55, %v828_v61 }
 0xef6   : > { %v837_v0 = vsel %vm834_vm2, %v836_v62, %v832_v63 }
 0xef7   : > { %v839_v1 = vmul.f32 2.0, %v837_v0  ;;  %v841_v5 = vmul.f32 %v837_v0, %v783_v44  ;;  %v964_v44 = vlaneseq }
 0xef9   : > { %v1585_v2 = vadd.f32 -1.0, %v839_v1  ;;  %v2079_v45 = vshrl.u32 %v964_v44, 7  ;;  %v2094_v58 = vand.u32 127, %v964_v44 }
 0xefb   : > { %843 = vrot.lane.b32.xlu1 %v1585_v2, %s1860_s20  ;;  %vm969_vm9 = vcmp.eq.s32.totalorder %v2079_v45, 6 }
 0xefc   : > { %v970_v48 = vsel %vm969_vm9, 0.0, %v1862_v47 }
 0xefd   : > { %v971_v49 = vadd.f32 %v970_v48, %v2085_v46 }
 0xf6d   : > { %v844_v3 = vpop.permute.xlu1 %843 }
 0xf6e   : > { %v846_v4 = vmul.f32 %v844_v3, %v837_v0 }
 0xf70   : > { %848 = vrot.lane.b32.xlu2 %v846_v4, %s1860_s20 }
 0xfca   : > { %v849_v6 = vpop.permute.xlu2 %848 }
 0xfcb   : > { %v851_v7 = vadd.f32 %v849_v6, %v841_v5 }
 0xfcd   : > { %1716 = vtanh.f32 %v851_v7 }
 0xfd3   : > { %v1717_v8 = vpop.eup %1716 }
 0xfd4   : > { %854 = vrot.lane.b32.xlu0 %v1717_v8, %s1860_s20 }
0x1046   : > { %v855_v9 = vpop.permute.xlu0 %854 }
0x1047   : > { %v857_v10 = vmul.f32 %v855_v9, %v837_v0  ;;  %v2109_v0 = vld [vmem:[%s2277_s6 + $0x8] sm:$0xff] }
0x1049   : > { %859 = vrot.lane.b32.xlu1 %v857_v10, %s1861_s23 }
0x10bb   : > { %v860_v11 = vpop.permute.xlu1 %859 }
0x10bc   : > { %862 = vst.msk [vmem:[#allocation3 + $0x6] sm:$0x1] %vm452_vm5, %v860_v11  ;;  %1586 = vmatmul.msk.f32.vlgmr.msra.gmra.mxu0 %vm350_vm0, %v860_v11 }
0x10bd   : > { %863 = vst.msk [vmem:[#allocation3 + $0x1] sm:$0x1] %vm454_vm6, %v860_v11 }
0x1139   : > { %v884_v13 = vpop.f32.mrf.mxu0 }
0x113a   : > { %v887_v14 = vadd.f32 %v884_v13, %v864_v12 }
0x113c   : > { %v1587_v15 = vmul.f32 -1.442695, %v887_v14 }
0x113e   : > { %1718 = vpow2.f32 %v1587_v15 }
0x1144   : > { %v1719_v16 = vpop.eup %1718 }
0x1145   : > { %v891_v17 = vadd.f32 1.0, %v1719_v16 }
0x1147   : > { %1720 = vrcp.f32 %v891_v17  ;;  %v903_v21 = vand.u32 2147483648, %v891_v17  ;;  %v901_v23 = vand.u32 2147483647, %v891_v17  ;;  %vm897_vm4 = vweird.f32 %v891_v17 }
0x1149   : > { %v904_v25 = vor.u32 1.1754944e-38, %v903_v21  ;;  %vm902_vm8 = vcmp.eq.f32.partialorder %v901_v23, 8.507059e+37 }
0x114d   : > { %v1721_v18 = vpop.eup %1720 }
0x114e   : > { %v893_v19 = vmul.f32 %v1721_v18, %v891_v17  ;;  %vm898_vm3 = vweird.f32 %v1721_v18 }
0x114f   : > { %vm899_vm7 = vmor %vm897_vm4, %vm898_vm3 }
0x1150   : > { %v894_v20 = vsub.f32 1.0, %v893_v19 }
0x1152   : > { %v895_v22 = vmul.f32 %v1721_v18, %v894_v20 }
0x1154   : > { %v896_v24 = vadd.f32 %v1721_v18, %v895_v22 }
0x1156   : > { %v900_v26 = vsel %vm899_vm7, %v1721_v18, %v896_v24 }
0x1157   : > { %v905_v27 = vsel %vm902_vm8, %v904_v25, %v900_v26 }
0x1158   : > { %v907_v28 = vmul.f32 2.0, %v905_v27  ;;  %v909_v32 = vmul.f32 %v905_v27, %v851_v7 }
0x115a   : > { %v1588_v29 = vadd.f32 -1.0, %v907_v28 }
0x115c   : > { %911 = vrot.lane.b32.xlu2 %v1588_v29, %s1860_s20 }
0x11b6   : > { %v912_v30 = vpop.permute.xlu2 %911 }
0x11b7   : > { %v914_v31 = vmul.f32 %v912_v30, %v905_v27 }
0x11b9   : > { %916 = vrot.lane.b32.xlu0 %v914_v31, %s1860_s20 }
0x122b   : > { %v917_v33 = vpop.permute.xlu0 %916 }
0x122c   : > { %v919_v34 = vadd.f32 %v917_v33, %v909_v32 }
0x122e   : > { %1722 = vtanh.f32 %v919_v34 }
0x1234   : > { %v1723_v35 = vpop.eup %1722 }
0x1235   : > { %922 = vrot.lane.b32.xlu1 %v1723_v35, %s1860_s20  ;;  %s1863_s20 = smov 121  }
0x12a7   : > { %v923_v36 = vpop.permute.xlu1 %922 }
0x12a8   : > { %v925_v37 = vmul.f32 %v923_v36, %v905_v27 }
0x12aa   : > { %927 = vrot.lane.b32.xlu2 %v925_v37, %s1861_s23  ;;  %s340_s23 = scalar_lea.vmem %s2278_s7, %s1984_s18  ;;  %s332_s18 = sand.u32 1, %s1846_s28  }
0x1304   : > { %v928_v42 = vpop.permute.xlu2 %927 }
0x1305   : > { %930 = vst.msk [vmem:[#allocation3 + $0x7] sm:$0x1] %vm452_vm5, %v928_v42  ;;  %vm972_vm5 = vcmask 64512  }
0x1306   : > { %931 = vst.msk [vmem:[#allocation3] sm:$0x1] %vm454_vm6, %v928_v42  ;;  %v973_v50 = vsel %vm972_vm5, %v971_v49, -inf  ;;  %vm2100_vm6 = vcmp.eq.s32.totalorder %v2079_v45, %v2094_v58 }
0x1307   : > { %v974_v51 = vrot.slane %v973_v50, 4 }
0x1309   : > { %v975_v52 = vmax.f32 %v973_v50, %v974_v51 }
0x130b   : > { %v976_v53 = vrot.slane %v975_v52, 2 }
0x130d   : > { %v932_v43 = vld [vmem:[#allocation3] sm:$0xff]  ;;  %v977_v54 = vmax.f32 %v975_v52, %v976_v53 }
0x130e   : > { %1589 = vmatmul.msk.f32.vlgmr.msra.gmra.mxu1 %vm350_vm0, %v932_v43  ;;  %vm992_vm0 = vcmask 57344  }
0x130f   : > { %v978_v55 = vrot.slane %v977_v54, 1 }
0x1311   : > { %v979_v56 = vmax.f32 %v977_v54, %v978_v55 }
0x138b   : > { %v959_v59 = vpop.f32.mrf.mxu1 }
0x138c   : > { %v2096_v60 = vadd.f32 %v1675_v57, %v959_v59 }
0x138e   : > { %v1026_v62 = vperm.slane %v2096_v60, 1  ;;  %v994_v63 = vadd.f32 %v979_v56, %v2096_v60  ;;  %v1144_v5 = vperm.slane %v2096_v60, 5  ;;  %v1085_v29 = vperm.slane %v2096_v60, 3 }
0x138f   : > { %v1203_v57 = vperm.slane %v2096_v60, 7 }
0x1390   : > { %v1027_v1 = vsel %vm2100_vm6, %v1026_v62, 0.0  ;;  %v995_v2 = vperm.slane %v994_v63, 0  ;;  %v1145_v7 = vsel %vm2100_vm6, %v1144_v5, 0.0  ;;  %v1086_v32 = vsel %vm2100_vm6, %v1085_v29, 0.0 }
0x1391   : > { %v1028_v3 = vsel %vm972_vm5, %v1027_v1, 0.0  ;;  %v1146_v8 = vsel %vm972_vm5, %v1145_v7, 0.0  ;;  %v1087_v34 = vsel %vm972_vm5, %v1086_v32, 0.0  ;;  %v1204_v63 = vsel %vm2100_vm6, %v1203_v57, 0.0 }
0x1392   : > { %1029 = vadd.xlane.f32.xlu1 %v1028_v3  ;;  %v2115_v4 = vadd.f32 %v995_v2, %v2109_v0  ;;  %v1205_v2 = vsel %vm972_vm5, %v1204_v63, 0.0 }
0x1394   : > { %v997_v6 = vsel %vm972_vm5, %v2115_v4, -inf }
0x1395   : > { %998 = vmax.xlane.f32.xlu0 %v997_v6 }
0x139a   : > { %1147 = vadd.xlane.f32.xlu1 %v1146_v8 }
0x1405   : > { %v1030_v9 = vpop.xlane.xlu1 %1029 }
0x1408   : > { %v2123_v10 = vpop.xlane.xlu0 %998 }
0x1409   : > { %v1031_v11 = vadd.f32 %v1030_v9, %v2123_v10 }
0x140b   : > { %v1032_v12 = vadd.f32 %v1031_v11, %v2085_v46 }
0x140d   : > { %v1033_v13 = vsel %vm972_vm5, %v1032_v12, -inf  ;;  %v1148_v3 = vpop.xlane.xlu1 %1147 }
0x140e   : > { %v1034_v14 = vrot.slane %v1033_v13, 4 }
0x1410   : > { %v1035_v15 = vmax.f32 %v1033_v13, %v1034_v14 }
0x1412   : > { %v1036_v16 = vrot.slane %v1035_v15, 2 }
0x1414   : > { %v1037_v17 = vmax.f32 %v1035_v15, %v1036_v16 }
0x1416   : > { %v1038_v18 = vrot.slane %v1037_v17, 1 }
0x1418   : > { %v1039_v19 = vmax.f32 %v1037_v17, %v1038_v18 }
0x141a   : > { %vm1040_vm10 = vcmp.eq.f32.partialorder %v1032_v12, %v1039_v19  ;;  %v1053_v20 = vadd.f32 %v1039_v19, %v2096_v60 }
0x141b   : > { %v1041_v21 = vsel %vm1040_vm10, %v2079_v45, 8  ;;  %vm1210_vm10 = vcmp.eq.s32.totalorder %v2079_v45, 7 }
0x141c   : > { %v1042_v22 = vsel %vm972_vm5, %v1041_v21, 2147483647  ;;  %v1054_v23 = vperm.slane %v1053_v20, 2 }
0x141d   : > { %v1043_v24 = vrot.slane %v1042_v22, 4 }
0x141e   : > { %v2132_v25 = vadd.f32 %v1054_v23, %v2109_v0 }
0x141f   : > { %vm1044_vm11 = vcmp.lt.s32.totalorder %v1042_v22, %v1043_v24 }
0x1420   : > { %v1045_v26 = vsel %vm1044_vm11, %v1042_v22, %v1043_v24  ;;  %v1056_v27 = vsel %vm972_vm5, %v2132_v25, -inf }
0x1421   : > { %v1046_v28 = vrot.slane %v1045_v26, 2  ;;  %1057 = vmax.xlane.f32.xlu2 %v1056_v27 }
0x1423   : > { %vm1047_vm12 = vcmp.lt.s32.totalorder %v1045_v26, %v1046_v28 }
0x1424   : > { %v1048_v30 = vsel %vm1047_vm12, %v1045_v26, %v1046_v28  ;;  %vm1211_vm12 = vmor %vm1210_vm10, %vm969_vm9  ;;  %vm1280_vm10 = vcmp.eq.s32.totalorder %v2094_v58, 6 }
0x1425   : > { %v1049_v31 = vrot.slane %v1048_v30, 1 }
0x1427   : > { %vm1050_vm13 = vcmp.lt.s32.totalorder %v1048_v30, %v1049_v31 }
0x1428   : > { %v1051_v33 = vsel %vm1050_vm13, %v1048_v30, %v1049_v31  ;;  %vm1213_vm13 = vcmask 64568  }
0x1429   : > { %1052 = vst.msk [vmem:[#allocation4 + $0x2] sm:$0x1] %vm992_vm0, %v1051_v33  ;;  %1088 = vadd.xlane.f32.xlu2 %v1087_v34 }
0x1494   : > { %v2141_v35 = vpop.xlane.xlu2 %1057 }
0x149c   : > { %v1089_v36 = vpop.xlane.xlu2 %1088 }
0x149d   : > { %v1090_v37 = vadd.f32 %v1089_v36, %v2141_v35 }
0x149f   : > { %v1091_v38 = vadd.f32 %v1090_v37, %v2085_v46 }
0x14a1   : > { %v1092_v39 = vsel %vm972_vm5, %v1091_v38, -inf }
0x14a2   : > { %v1093_v40 = vrot.slane %v1092_v39, 4 }
0x14a4   : > { %v1094_v41 = vmax.f32 %v1092_v39, %v1093_v40 }
0x14a6   : > { %v1095_v42 = vrot.slane %v1094_v41, 2 }
0x14a8   : > { %v1096_v43 = vmax.f32 %v1094_v41, %v1095_v42 }
0x14aa   : > { %v1097_v44 = vrot.slane %v1096_v43, 1 }
0x14ac   : > { %v1098_v47 = vmax.f32 %v1096_v43, %v1097_v44 }
0x14ae   : > { %vm1099_vm14 = vcmp.eq.f32.partialorder %v1091_v38, %v1098_v47  ;;  %v1112_v48 = vadd.f32 %v1098_v47, %v2096_v60 }
0x14af   : > { %v1100_v49 = vsel %vm1099_vm14, %v2079_v45, 8 }
0x14b0   : > { %v1101_v50 = vsel %vm972_vm5, %v1100_v49, 2147483647  ;;  %v1113_v51 = vperm.slane %v1112_v48, 4 }
0x14b1   : > { %v1102_v52 = vrot.slane %v1101_v50, 4 }
0x14b2   : > { %v2150_v53 = vadd.f32 %v1113_v51, %v2109_v0 }
0x14b3   : > { %vm1103_vm15 = vcmp.lt.s32.totalorder %v1101_v50, %v1102_v52 }
0x14b4   : > { %v1104_v54 = vsel %vm1103_vm15, %v1101_v50, %v1102_v52  ;;  %v1115_v55 = vsel %vm972_vm5, %v2150_v53, -inf }
0x14b5   : > { %v1105_v56 = vrot.slane %v1104_v54, 2  ;;  %1116 = vmax.xlane.f32.xlu0 %v1115_v55 }
0x14b7   : > { %vm1106_vm1 = vcmp.lt.s32.totalorder %v1104_v54, %v1105_v56 }
0x14b8   : > { %v1107_v59 = vsel %vm1106_vm1, %v1104_v54, %v1105_v56 }
0x14b9   : > { %v1108_v62 = vrot.slane %v1107_v59, 1 }
0x14bb   : > { %vm1109_vm2 = vcmp.lt.s32.totalorder %v1107_v59, %v1108_v62 }
0x14bc   : > { %v1110_v1 = vsel %vm1109_vm2, %v1107_v59, %v1108_v62 }
0x14bd   : > { %1111 = vst.msk [vmem:[#allocation4 + $0x4] sm:$0x1] %vm992_vm0, %v1110_v1  ;;  %1206 = vadd.xlane.f32.xlu0 %v1205_v2 }
0x1528   : > { %v2159_v5 = vpop.xlane.xlu0 %1116 }
0x1529   : > { %v1149_v6 = vadd.f32 %v1148_v3, %v2159_v5 }
0x152b   : > { %v1150_v7 = vadd.f32 %v1149_v6, %v2085_v46 }
0x152d   : > { %v1151_v8 = vsel %vm972_vm5, %v1150_v7, -inf }
0x152e   : > { %v1152_v9 = vrot.slane %v1151_v8, 4 }
0x1530   : > { %v1153_v11 = vmax.f32 %v1151_v8, %v1152_v9 }
0x1532   : > { %v1154_v12 = vrot.slane %v1153_v11, 2 }
0x1534   : > { %v1155_v13 = vmax.f32 %v1153_v11, %v1154_v12 }
0x1536   : > { %v1156_v14 = vrot.slane %v1155_v13, 1 }
0x1538   : > { %v1157_v15 = vmax.f32 %v1155_v13, %v1156_v14 }
0x153a   : > { %vm1158_vm3 = vcmp.eq.f32.partialorder %v1150_v7, %v1157_v15  ;;  %v1171_v16 = vadd.f32 %v1157_v15, %v2096_v60  ;;  %v1207_v60 = vpop.xlane.xlu0 %1206 }
0x153b   : > { %v1159_v17 = vsel %vm1158_vm3, %v2079_v45, 8 }
0x153c   : > { %v1160_v18 = vsel %vm972_vm5, %v1159_v17, 2147483647  ;;  %v1172_v19 = vperm.slane %v1171_v16, 6 }
0x153d   : > { %v1161_v20 = vrot.slane %v1160_v18, 4 }
0x153e   : > { %v1173_v21 = vadd.f32 %v1172_v19, %v2109_v0 }
0x153f   : > { %vm1162_vm4 = vcmp.lt.s32.totalorder %v1160_v18, %v1161_v20 }
0x1540   : > { %v1163_v22 = vsel %vm1162_vm4, %v1160_v18, %v1161_v20  ;;  %v1174_v23 = vsel %vm972_vm5, %v1173_v21, -inf  ;;  %vm1118_vm4 = vcmp.eq.f32.partialorder %v2150_v53, %v2159_v5 }
0x1541   : > { %v1164_v24 = vrot.slane %v1163_v22, 2  ;;  %1175 = vmax.xlane.f32.xlu2 %v1174_v23 }
0x1543   : > { %vm1165_vm7 = vcmp.lt.s32.totalorder %v1163_v22, %v1164_v24 }
0x1544   : > { %v1166_v26 = vsel %vm1165_vm7, %v1163_v22, %v1164_v24 }
0x1545   : > { %v1167_v27 = vrot.slane %v1166_v26, 1 }
0x1547   : > { %vm1168_vm8 = vcmp.lt.s32.totalorder %v1166_v26, %v1167_v27 }
0x1548   : > { %v1169_v28 = vsel %vm1168_vm8, %v1166_v26, %v1167_v27  ;;  %vm1254_vm8 = vcmp.eq.s32.totalorder %v2094_v58, 7 }
0x1549   : > { %1170 = vst.msk [vmem:[#allocation4 + $0x6] sm:$0x1] %vm992_vm0, %v1169_v28 }
0x15b4   : > { %v1176_v29 = vpop.xlane.xlu2 %1175 }
0x15b5   : > { %vm1177_vm11 = vcmp.eq.f32.partialorder %v1173_v21, %v1176_v29  ;;  %v1208_v30 = vadd.f32 %v1207_v60, %v1176_v29  ;;  %v1119_v60 = vsel %vm1118_vm4, %v2094_v58, 8  ;;  %vm1000_vm4 = vcmp.eq.f32.partialorder %v2115_v4, %v2123_v10 }
0x15b6   : > { %v1178_v0 = vsel %vm1177_vm11, %v2094_v58, 8 }
0x15b7   : > { %v1209_v31 = vadd.f32 %v1208_v30, %v2085_v46  ;;  %v1179_v32 = vsel %vm972_vm5, %v1178_v0, 2147483647 }
0x15b8   : > { %v1181_v33 = vshra.s32 %v1179_v32, 16  ;;  %v1180_v49 = vand.u32 65535, %v1179_v32  ;;  %v1120_v32 = vsel %vm972_vm5, %v1119_v60, 2147483647 }
0x15b9   : > { %v1212_v34 = vsel %vm1211_vm12, -10000.0, %v1209_v31 }
0x15ba   : > { %v1183_v36 = vcvt.s32.f32 %v1181_v33  ;;  %v1214_v37 = vsel %vm1213_vm13, %v1212_v34, -inf  ;;  %v1182_v51 = vcvt.s32.f32 %v1180_v49  ;;  %v1122_v33 = vshra.s32 %v1120_v32, 16 }
0x15bb   : > { %v1215_v38 = vrot.slane %v1214_v37, 4 }
0x15bc   : > { %1184 = vmin.xlane.f32.xlu2 %v1183_v36 }
0x15bd   : > { %v1216_v39 = vmax.f32 %v1214_v37, %v1215_v38 }
0x15bf   : > { %v1217_v40 = vrot.slane %v1216_v39, 2 }
0x15c1   : > { %v1218_v41 = vmax.f32 %v1216_v39, %v1217_v40 }
0x15c3   : > { %v1219_v42 = vrot.slane %v1218_v41, 1 }
0x15c5   : > { %v2176_v43 = vmax.f32 %v1218_v41, %v1219_v42 }
0x15c7   : > { %vm1221_vm9 = vcmp.eq.f32.partialorder %v1212_v34, %v2176_v43  ;;  %v1124_v34 = vcvt.s32.f32 %v1122_v33 }
0x15c8   : > { %v1222_v44 = vsel %vm1221_vm9, %v2079_v45, 8  ;;  %vm1059_vm9 = vcmp.eq.f32.partialorder %v2132_v25, %v2141_v35 }
0x15c9   : > { %v1223_v46 = vsel %vm1213_vm13, %v1222_v44, 2147483647  ;;  %vm1306_vm13 = vcmp.eq.s32.totalorder %v2094_v58, 5 }
0x15ca   : > { %v1225_v47 = vshra.s32 %v1223_v46, 16  ;;  %v1224_v54 = vand.u32 65535, %v1223_v46 }
0x15cc   : > { %v1227_v48 = vcvt.s32.f32 %v1225_v47  ;;  %v1226_v56 = vcvt.s32.f32 %v1224_v54 }
0x15ce   : > { %1228 = vmin.xlane.f32.xlu1 %v1227_v48 }
0x162f   : > { %v1185_v50 = vpop.xlane.xlu2 %1184 }
0x1630   : > { %vm1186_vm14 = vcmp.eq.f32.partialorder %v1183_v36, %v1185_v50  ;;  %v1191_v59 = vcvt.f32.s32 %v1185_v50 }
0x1631   : > { %v1187_v52 = vsel %vm1186_vm14, %v1182_v51, inf  ;;  %v1283_v51 = vld [vmem:[#allocation4 + $0x6] sm:$0x1] }
0x1632   : > { %1188 = vmin.xlane.f32.xlu1 %v1187_v52  ;;  %v1192_v63 = vshll.u32 %v1191_v59, 16 }
0x1641   : > { %v1229_v55 = vpop.xlane.xlu1 %1228 }
0x1642   : > { %vm1230_vm15 = vcmp.eq.f32.partialorder %v1227_v48, %v1229_v55  ;;  %v1235_v11 = vcvt.f32.s32 %v1229_v55 }
0x1643   : > { %v1231_v57 = vsel %vm1230_vm15, %v1226_v56, inf  ;;  %vm1332_vm15 = vcmp.eq.s32.totalorder %v2094_v58, 4 }
0x1644   : > { %1232 = vmin.xlane.f32.xlu0 %v1231_v57  ;;  %v1236_v15 = vshll.u32 %v1235_v11, 16 }
0x16a5   : > { %v1189_v62 = vpop.xlane.xlu1 %1188 }
0x16a6   : > { %v1190_v45 = vcvt.f32.s32 %v1189_v62 }
0x16a8   : > { %v1193_v1 = vadd.s32 %v1192_v63, %v1190_v45  ;;  %v1121_v63 = vand.u32 65535, %v1120_v32 }
0x16aa   : > { %v1194_v2 = vsel %vm2100_vm6, %v1193_v1, 0  ;;  %v1123_v45 = vcvt.s32.f32 %v1121_v63 }
0x16ab   : > { %v1195_v3 = vsel %vm972_vm5, %v1194_v2, 0 }
0x16ac   : > { %v1196_v6 = vrot.slane %v1195_v3, 4 }
0x16ae   : > { %v1197_v7 = vadd.s32 %v1196_v6, %v1195_v3 }
0x16b0   : > { %v1198_v8 = vrot.slane %v1197_v7, 2 }
0x16b2   : > { %v1199_v9 = vadd.s32 %v1198_v8, %v1197_v7 }
0x16b4   : > { %v1200_v12 = vrot.slane %v1199_v9, 1 }
0x16b6   : > { %v1201_v13 = vadd.s32 %v1200_v12, %v1199_v9 }
0x16b7   : > { %v1233_v14 = vpop.xlane.xlu0 %1232 }
0x16b8   : > { %1202 = vst.msk [vmem:[#allocation4 + $0x7] sm:$0x1] %vm992_vm0, %v1201_v13  ;;  %v1234_v16 = vcvt.f32.s32 %v1233_v14 }
0x16ba   : > { %v1237_v17 = vadd.s32 %v1236_v15, %v1234_v16 }
0x16bc   : > { %v1238_v18 = vrot.slane %v1237_v17, 4 }
0x16be   : > { %vm1239_vm1 = vcmp.lt.s32.totalorder %v1237_v17, %v1238_v18 }
0x16bf   : > { %v1240_v19 = vsel %vm1239_vm1, %v1237_v17, %v1238_v18  ;;  %v1257_v26 = vld [vmem:[#allocation4 + $0x7] sm:$0x1] }
0x16c0   : > { %v1241_v20 = vrot.slane %v1240_v19, 2 }
0x16c2   : > { %vm1242_vm2 = vcmp.lt.s32.totalorder %v1240_v19, %v1241_v20 }
0x16c3   : > { %v1243_v21 = vsel %vm1242_vm2, %v1240_v19, %v1241_v20 }
0x16c4   : > { %v1244_v22 = vrot.slane %v1243_v21, 1 }
0x16c6   : > { %vm1245_vm3 = vcmp.lt.s32.totalorder %v1243_v21, %v1244_v22 }
0x16c7   : > { %v1246_v23 = vsel %vm1245_vm3, %v1243_v21, %v1244_v22  ;;  %vm1358_vm3 = vcmp.eq.s32.totalorder %v2094_v58, 3 }
0x16c8   : > { %1592 = vpush %v1246_v23 }
0x16f9   : > { %s2184_s26 = spop %1592 }
0x16fa   : > { %v1255_v24 = vstv %s2184_s26 }
0x16fb   : > { %vm1258_vm7 = vcmp.eq.s32.totalorder %v2094_v58, %v1255_v24  ;;  %v1256_v48 = vsel %vm1254_vm8, %v1255_v24, 0  ;;  %vm1384_vm8 = vcmp.eq.s32.totalorder %v2094_v58, 2 }
0x16fc   : > { %v1259_v27 = vsel %vm1258_vm7, %v1257_v26, 0 }
0x16fd   : > { %v1260_v28 = vsel %vm992_vm0, %v1259_v27, 0 }
0x16fe   : > { %v1262_v29 = vshrl.u32 %v1260_v28, 16  ;;  %v1261_v30 = vand.u32 65535, %v1260_v28 }
0x1700   : > { %v1264_v0 = vcvt.s32.f32 %v1262_v29  ;;  %v1263_v31 = vcvt.s32.f32 %v1261_v30 }
0x1702   : > { %1267 = vadd.xlane.f32.xlu2 %v1264_v0  ;;  %1265 = vadd.xlane.f32.xlu0 %v1263_v31 }
0x170a   : > { %1125 = vmin.xlane.f32.xlu2 %v1124_v34 }
0x1775   : > { %v1268_v53 = vpop.xlane.xlu2 %1267  ;;  %v1266_v5 = vpop.xlane.xlu0 %1265 }
0x1776   : > { %v1270_v36 = vcvt.f32.s32 %v1268_v53  ;;  %v1269_v38 = vcvt.f32.s32 %v1266_v5 }
0x1778   : > { %v1271_v37 = vshll.u32 %v1270_v36, 16 }
0x177a   : > { %v1272_v39 = vadd.s32 %v1271_v37, %v1269_v38 }
0x177c   : > { %v1273_v40 = vrot.slane %v1272_v39, 4 }
0x177d   : > { %v1126_v62 = vpop.xlane.xlu2 %1125 }
0x177e   : > { %v1274_v41 = vadd.s32 %v1273_v40, %v1272_v39  ;;  %vm1127_vm12 = vcmp.eq.f32.partialorder %v1124_v34, %v1126_v62  ;;  %v1132_v9 = vcvt.f32.s32 %v1126_v62  ;;  %v1060_v34 = vsel %vm1059_vm9, %v2094_v58, 8 }
0x177f   : > { %v1128_v1 = vsel %vm1127_vm12, %v1123_v45, inf  ;;  %v1061_v38 = vsel %vm972_vm5, %v1060_v34, 2147483647  ;;  %vm1252_vm12 = vcmask 0  }
0x1780   : > { %v1275_v42 = vrot.slane %v1274_v41, 2  ;;  %v1133_v14 = vshll.u32 %v1132_v9, 16  ;;  %v1063_v39 = vshra.s32 %v1061_v38, 16 }
0x1782   : > { %v1276_v44 = vadd.s32 %v1275_v42, %v1274_v41  ;;  %v1065_v40 = vcvt.s32.f32 %v1063_v39 }
0x1784   : > { %v1277_v46 = vrot.slane %v1276_v44, 1 }
0x1786   : > { %v1278_v47 = vadd.s32 %v1277_v46, %v1276_v44 }
0x1788   : > { %1594 = vpush %v1278_v47 }
0x17b9   : > { %s1595_s10 = spop %1594 }
0x17ba   : > { %v1281_v49 = vstv %s1595_s10  ;;  %s1455_s10 = scalar_lea.hbm %s2279_s8, %s1930_s9 }
0x17bb   : > { %v1282_v50 = vsel %vm1280_vm10, %v1281_v49, %v1256_v48  ;;  %vm1284_vm11 = vcmp.eq.s32.totalorder %v2094_v58, %v1281_v49 }
0x17bc   : > { %v1285_v52 = vsel %vm1284_vm11, %v1283_v51, 0 }
0x17bd   : > { %v1286_v54 = vsel %vm992_vm0, %v1285_v52, 0 }
0x17be   : > { %v1288_v55 = vshrl.u32 %v1286_v54, 16  ;;  %v1287_v56 = vand.u32 65535, %v1286_v54 }
0x17c0   : > { %v1290_v57 = vcvt.s32.f32 %v1288_v55  ;;  %v1289_v59 = vcvt.s32.f32 %v1287_v56  ;;  %v1335_v56 = vld [vmem:[#allocation4 + $0x4] sm:$0x1] }
0x17c2   : > { %1293 = vadd.xlane.f32.xlu1 %v1290_v57  ;;  %1291 = vadd.xlane.f32.xlu0 %v1289_v59 }
0x17ca   : > { %1129 = vmin.xlane.f32.xlu1 %v1128_v1 }
0x1835   : > { %v1294_v2 = vpop.xlane.xlu1 %1293  ;;  %v1292_v3 = vpop.xlane.xlu0 %1291 }
0x1836   : > { %v1296_v6 = vcvt.f32.s32 %v1294_v2  ;;  %v1295_v8 = vcvt.f32.s32 %v1292_v3  ;;  %v1062_v3 = vand.u32 65535, %v1061_v38 }
0x1838   : > { %v1297_v7 = vshll.u32 %v1296_v6, 16  ;;  %v1064_v6 = vcvt.s32.f32 %v1062_v3 }
0x183a   : > { %v1298_v11 = vadd.s32 %v1297_v7, %v1295_v8 }
0x183c   : > { %v1299_v12 = vrot.slane %v1298_v11, 4 }
0x183d   : > { %v1130_v13 = vpop.xlane.xlu1 %1129 }
0x183e   : > { %v1300_v15 = vadd.s32 %v1299_v12, %v1298_v11  ;;  %v1131_v16 = vcvt.f32.s32 %v1130_v13 }
0x1840   : > { %v1134_v17 = vadd.s32 %v1133_v14, %v1131_v16  ;;  %v1301_v18 = vrot.slane %v1300_v15, 2 }
0x1842   : > { %v1135_v19 = vsel %vm2100_vm6, %v1134_v17, 0  ;;  %v1302_v20 = vadd.s32 %v1301_v18, %v1300_v15 }
0x1843   : > { %v1136_v21 = vsel %vm972_vm5, %v1135_v19, 0 }
0x1844   : > { %v1137_v22 = vrot.slane %v1136_v21, 4  ;;  %v1303_v23 = vrot.slane %v1302_v20, 1 }
0x1846   : > { %v1138_v24 = vadd.s32 %v1137_v22, %v1136_v21  ;;  %v1304_v26 = vadd.s32 %v1303_v23, %v1302_v20 }
0x1848   : > { %v1139_v27 = vrot.slane %v1138_v24, 2  ;;  %1596 = vpush %v1304_v26 }
0x184a   : > { %v1140_v28 = vadd.s32 %v1139_v27, %v1138_v24 }
0x184c   : > { %v1141_v60 = vrot.slane %v1140_v28, 1 }
0x184e   : > { %v1142_v29 = vadd.s32 %v1141_v60, %v1140_v28 }
0x1850   : > { %1143 = vst.msk [vmem:[#allocation4 + $0x5] sm:$0x1] %vm992_vm0, %v1142_v29 }
0x1857   : > { %v1309_v31 = vld [vmem:[#allocation4 + $0x5] sm:$0x1] }
0x1879   : > { %s1597_s12 = spop %1596 }
0x187a   : > { %v1307_v30 = vstv %s1597_s12  ;;  %s333_s12 = scalar_lea.vmem [#allocation10], %s332_s18 }
0x187b   : > { %v1308_v0 = vsel %vm1306_vm13, %v1307_v30, %v1282_v50  ;;  %vm1310_vm14 = vcmp.eq.s32.totalorder %v2094_v58, %v1307_v30  ;;  %vm1436_vm13 = vcmp.eq.s32.totalorder %v2094_v58, 0 }
0x187c   : > { %v1311_v32 = vsel %vm1310_vm14, %v1309_v31, 0 }
0x187d   : > { %v1312_v33 = vsel %vm992_vm0, %v1311_v32, 0 }
0x187e   : > { %v1314_v53 = vshrl.u32 %v1312_v33, 16  ;;  %v1313_v5 = vand.u32 65535, %v1312_v33 }
0x1880   : > { %v1316_v36 = vcvt.s32.f32 %v1314_v53  ;;  %v1315_v37 = vcvt.s32.f32 %v1313_v5 }
0x1882   : > { %1319 = vadd.xlane.f32.xlu2 %v1316_v36  ;;  %1317 = vadd.xlane.f32.xlu0 %v1315_v37  ;;  %v1001_v37 = vsel %vm1000_vm4, %v2094_v58, 8 }
0x188a   : > { %1066 = vmin.xlane.f32.xlu2 %v1065_v40 }
0x18f5   : > { %v1320_v25 = vpop.xlane.xlu2 %1319  ;;  %v1318_v35 = vpop.xlane.xlu0 %1317 }
0x18f6   : > { %v1322_v41 = vcvt.f32.s32 %v1320_v25  ;;  %v1321_v44 = vcvt.f32.s32 %v1318_v35  ;;  %v1002_v35 = vsel %vm972_vm5, %v1001_v37, 2147483647 }
0x18f8   : > { %v1323_v42 = vshll.u32 %v1322_v41, 16  ;;  %v1004_v41 = vshra.s32 %v1002_v35, 16 }
0x18fa   : > { %v1324_v46 = vadd.s32 %v1323_v42, %v1321_v44  ;;  %v1006_v42 = vcvt.s32.f32 %v1004_v41 }
0x18fc   : > { %v1325_v47 = vrot.slane %v1324_v46, 4 }
0x18fd   : > { %v1067_v2 = vpop.xlane.xlu2 %1066 }
0x18fe   : > { %v1326_v48 = vadd.s32 %v1325_v47, %v1324_v46  ;;  %vm1068_vm2 = vcmp.eq.f32.partialorder %v1065_v40, %v1067_v2  ;;  %v1073_v14 = vcvt.f32.s32 %v1067_v2 }
0x18ff   : > { %v1069_v7 = vsel %vm1068_vm2, %v1064_v6, inf }
0x1900   : > { %v1327_v49 = vrot.slane %v1326_v48, 2  ;;  %v1074_v18 = vshll.u32 %v1073_v14, 16 }
0x1902   : > { %v1328_v50 = vadd.s32 %v1327_v49, %v1326_v48 }
0x1904   : > { %v1329_v51 = vrot.slane %v1328_v50, 1 }
0x1906   : > { %v1330_v52 = vadd.s32 %v1329_v51, %v1328_v50 }
0x1908   : > { %1598 = vpush %v1330_v52 }
0x1939   : > { %s1599_s13 = spop %1598 }
0x193a   : > { %v1333_v54 = vstv %s1599_s13  ;;  %s1457_s13 = sshll.u32 %s333_s12, 4  ;;  %s1458_s13 = int_to_ptr.vmem [resolvable:$true] %s1457_s13 }
0x193b   : > { %v1334_v55 = vsel %vm1332_vm15, %v1333_v54, %v1308_v0  ;;  %vm1336_vm1 = vcmp.eq.s32.totalorder %v2094_v58, %v1333_v54 }
0x193c   : > { %v1337_v57 = vsel %vm1336_vm1, %v1335_v56, 0 }
0x193d   : > { %v1338_v59 = vsel %vm992_vm0, %v1337_v57, 0 }
0x193e   : > { %v1340_v62 = vshrl.u32 %v1338_v59, 16  ;;  %v1339_v63 = vand.u32 65535, %v1338_v59  ;;  %v1387_v59 = vld [vmem:[#allocation4 + $0x2] sm:$0x1] }
0x1940   : > { %v1342_v45 = vcvt.s32.f32 %v1340_v62  ;;  %v1341_v1 = vcvt.s32.f32 %v1339_v63 }
0x1942   : > { %1345 = vadd.xlane.f32.xlu1 %v1342_v45  ;;  %1343 = vadd.xlane.f32.xlu0 %v1341_v1 }
0x194a   : > { %1070 = vmin.xlane.f32.xlu1 %v1069_v7  ;;  %v1003_v7 = vand.u32 65535, %v1002_v35 }
0x19b5   : > { %v1346_v8 = vpop.xlane.xlu1 %1345  ;;  %v1344_v9 = vpop.xlane.xlu0 %1343 }
0x19b6   : > { %v1348_v11 = vcvt.f32.s32 %v1346_v8  ;;  %v1347_v13 = vcvt.f32.s32 %v1344_v9  ;;  %v1005_v8 = vcvt.s32.f32 %v1003_v7 }
0x19b8   : > { %v1349_v12 = vshll.u32 %v1348_v11, 16 }
0x19ba   : > { %v1350_v15 = vadd.s32 %v1349_v12, %v1347_v13 }
0x19bc   : > { %v1351_v16 = vrot.slane %v1350_v15, 4 }
0x19bd   : > { %v1071_v17 = vpop.xlane.xlu1 %1070 }
0x19be   : > { %v1352_v19 = vadd.s32 %v1351_v16, %v1350_v15  ;;  %v1072_v20 = vcvt.f32.s32 %v1071_v17 }
0x19c0   : > { %v1075_v21 = vadd.s32 %v1074_v18, %v1072_v20  ;;  %v1353_v22 = vrot.slane %v1352_v19, 2 }
0x19c2   : > { %v1076_v23 = vsel %vm2100_vm6, %v1075_v21, 0  ;;  %v1354_v24 = vadd.s32 %v1353_v22, %v1352_v19 }
0x19c3   : > { %v1077_v26 = vsel %vm972_vm5, %v1076_v23, 0 }
0x19c4   : > { %v1078_v27 = vrot.slane %v1077_v26, 4  ;;  %v1355_v28 = vrot.slane %v1354_v24, 1 }
0x19c6   : > { %v1079_v60 = vadd.s32 %v1078_v27, %v1077_v26  ;;  %v1356_v29 = vadd.s32 %v1355_v28, %v1354_v24 }
0x19c8   : > { %v1080_v30 = vrot.slane %v1079_v60, 2  ;;  %1600 = vpush %v1356_v29 }
0x19ca   : > { %v1081_v0 = vadd.s32 %v1080_v30, %v1079_v60 }
0x19cc   : > { %v1082_v31 = vrot.slane %v1081_v0, 1 }
0x19ce   : > { %v1083_v32 = vadd.s32 %v1082_v31, %v1081_v0 }
0x19d0   : > { %1084 = vst.msk [vmem:[#allocation4 + $0x3] sm:$0x1] %vm992_vm0, %v1083_v32 }
0x19d7   : > { %v1361_v53 = vld [vmem:[#allocation4 + $0x3] sm:$0x1] }
0x19f9   : > { %s1601_s19 = spop %1600 }
0x19fa   : > { %v1359_v33 = vstv %s1601_s19  ;;  %s1459_s19 = sshll.u32 %s1455_s10, 4  ;;  %s1460_s19 = int_to_ptr.hbm [resolvable:$true] %s1459_s19 }
0x19fb   : > { %v1360_v34 = vsel %vm1358_vm3, %v1359_v33, %v1334_v55  ;;  %vm1362_vm7 = vcmp.eq.s32.totalorder %v2094_v58, %v1359_v33  ;;  %s1798_s21 = sshra.s32 %s1460_s19, 4  ;;  %s1799_s21 = int_to_ptr.hbm [resolvable:$true] %s1798_s21 }
0x19fc   : > { %v1363_v5 = vsel %vm1362_vm7, %v1361_v53, 0  ;;  %s1800_s22 = scalar_lea.hbm %s1799_s21, 1  ;;  %p1805_p3 = scmp.lt.s32.totalorder %s1799_s21, %s2279_s8 }
0x19fd   : > { %v1364_v36 = vsel %vm992_vm0, %v1363_v5, 0  ;;  %p1801_p0 = scmp.ne.s32.totalorder %s1799_s21, %s1800_s22 }
0x19fe   : > { %v1366_v38 = vshrl.u32 %v1364_v36, 16  ;;  %v1365_v39 = vand.u32 65535, %v1364_v36 }
0x19ff   : > { %p1802_p1 = pnand %p1801_p0, %p1947_p5 }
0x1a00   : > { %v1368_v40 = vcvt.s32.f32 %v1366_v38  ;;  %v1367_v25 = vcvt.s32.f32 %v1365_v39 }
0x1a01   : > { %p1803_p2 = pneg %p1802_p1 }
0x1a02   : > { %1371 = vadd.xlane.f32.xlu2 %v1368_v40  ;;  %1369 = vadd.xlane.f32.xlu0 %v1367_v25 }
0x1a0a   : > { %1007 = vmin.xlane.f32.xlu2 %v1006_v42 }
0x1a75   : > { %v1372_v4 = vpop.xlane.xlu2 %1371  ;;  %v1370_v10 = vpop.xlane.xlu0 %1369 }
0x1a76   : > { %v1374_v44 = vcvt.f32.s32 %v1372_v4  ;;  %v1373_v47 = vcvt.f32.s32 %v1370_v10 }
0x1a78   : > { %v1375_v46 = vshll.u32 %v1374_v44, 16 }
0x1a7a   : > { %v1376_v48 = vadd.s32 %v1375_v46, %v1373_v47 }
0x1a7c   : > { %v1377_v49 = vrot.slane %v1376_v48, 4 }
0x1a7d   : > { %v1008_v6 = vpop.xlane.xlu2 %1007 }
0x1a7e   : > { %v1378_v50 = vadd.s32 %v1377_v49, %v1376_v48  ;;  %vm1009_vm11 = vcmp.eq.f32.partialorder %v1006_v42, %v1008_v6  ;;  %v1014_v16 = vcvt.f32.s32 %v1008_v6 }
0x1a7f   : > { %v1010_v9 = vsel %vm1009_vm11, %v1005_v8, inf }
0x1a80   : > { %v1379_v51 = vrot.slane %v1378_v50, 2  ;;  %v1015_v20 = vshll.u32 %v1014_v16, 16 }
0x1a82   : > { %v1380_v52 = vadd.s32 %v1379_v51, %v1378_v50 }
0x1a84   : > { %v1381_v54 = vrot.slane %v1380_v52, 1 }
0x1a86   : > { %v1382_v55 = vadd.s32 %v1381_v54, %v1380_v52 }
0x1a88   : > { %1602 = vpush %v1382_v55 }
0x1ab9   : > { %s1603_s17 = spop %1602 }
0x1aba   : > { %v1385_v56 = vstv %s1603_s17 }
0x1abb   : > { %v1386_v57 = vsel %vm1384_vm8, %v1385_v56, %v1360_v34  ;;  %vm1388_vm10 = vcmp.eq.s32.totalorder %v2094_v58, %v1385_v56 }
0x1abc   : > { %v1389_v62 = vsel %vm1388_vm10, %v1387_v59, 0 }
0x1abd   : > { %v1390_v63 = vsel %vm992_vm0, %v1389_v62, 0 }
0x1abe   : > { %v1392_v45 = vshrl.u32 %v1390_v63, 16  ;;  %v1391_v1 = vand.u32 65535, %v1390_v63 }
0x1ac0   : > { %v1394_v2 = vcvt.s32.f32 %v1392_v45  ;;  %v1393_v3 = vcvt.s32.f32 %v1391_v1 }
0x1ac2   : > { %1397 = vadd.xlane.f32.xlu1 %v1394_v2  ;;  %1395 = vadd.xlane.f32.xlu0 %v1393_v3 }
0x1aca   : > { %1011 = vmin.xlane.f32.xlu1 %v1010_v9 }
0x1ae3   : > { %1249 = vrot.lane.b32.xlu1 %v2176_v43, %s1863_s20  ;;  %s1444_s20 = scalar_lea.sflag [#allocation7], %s332_s18 }
0x1b35   : > { %v1398_v11 = vpop.xlane.xlu1 %1397  ;;  %v1396_v12 = vpop.xlane.xlu0 %1395 }
0x1b36   : > { %v1400_v13 = vcvt.f32.s32 %v1398_v11  ;;  %v1399_v15 = vcvt.f32.s32 %v1396_v12 }
0x1b38   : > { %v1401_v14 = vshll.u32 %v1400_v13, 16 }
0x1b3a   : > { %v1402_v17 = vadd.s32 %v1401_v14, %v1399_v15 }
0x1b3c   : > { %v1403_v18 = vrot.slane %v1402_v17, 4 }
0x1b3d   : > { %v1012_v19 = vpop.xlane.xlu1 %1011 }
0x1b3e   : > { %v1404_v21 = vadd.s32 %v1403_v18, %v1402_v17  ;;  %v1013_v22 = vcvt.f32.s32 %v1012_v19 }
0x1b40   : > { %v1016_v23 = vadd.s32 %v1015_v20, %v1013_v22  ;;  %v1405_v24 = vrot.slane %v1404_v21, 2 }
0x1b42   : > { %v1017_v26 = vsel %vm2100_vm6, %v1016_v23, 0  ;;  %v1406_v27 = vadd.s32 %v1405_v24, %v1404_v21 }
0x1b43   : > { %v1018_v43 = vsel %vm972_vm5, %v1017_v26, 0  ;;  %vm1410_vm5 = vcmp.eq.s32.totalorder %v2094_v58, 1 }
0x1b44   : > { %v1019_v28 = vrot.slane %v1018_v43, 4  ;;  %v1407_v60 = vrot.slane %v1406_v27, 1 }
0x1b46   : > { %v1020_v29 = vadd.s32 %v1019_v28, %v1018_v43  ;;  %v1408_v30 = vadd.s32 %v1407_v60, %v1406_v27 }
0x1b48   : > { %v1021_v0 = vrot.slane %v1020_v29, 2  ;;  %1604 = vpush %v1408_v30 }
0x1b4a   : > { %v1022_v31 = vadd.s32 %v1021_v0, %v1020_v29 }
0x1b4c   : > { %v1023_v32 = vrot.slane %v1022_v31, 1 }
0x1b4e   : > { %v1024_v33 = vadd.s32 %v1023_v32, %v1022_v31 }
0x1b50   : > { %1025 = vst.msk [vmem:[#allocation4 + $0x1] sm:$0x1] %vm992_vm0, %v1024_v33 }
0x1b55   : > { %v1250_v61 = vpop.permute.xlu1 %1249 }
0x1b56   : > { %1253 = vst.msk [vmem:[%s340_s23] sm:$0x1] %vm1252_vm12, %v1250_v61 }
0x1b57   : > { %v1413_v5 = vld [vmem:[#allocation4 + $0x1] sm:$0x1] }
0x1b79   : > { %s1605_s24 = spop %1604 }
0x1b7a   : > { %v1411_v34 = vstv %s1605_s24  ;;  %s1804_s24 = scalar_lea.hbm %s2279_s8, 4 }
0x1b7b   : > { %v1412_v53 = vsel %vm1410_vm5, %v1411_v34, %v1386_v57  ;;  %vm1414_vm6 = vcmp.eq.s32.totalorder %v2094_v58, %v1411_v34  ;;  %p1806_p4 = scmp.lt.s32.totalorder %s1804_s24, %s1800_s22 }
0x1b7c   : > { %v1415_v36 = vsel %vm1414_vm6, %v1413_v5, 0 }
0x1b7d   : > { %v1416_v37 = vsel %vm992_vm0, %v1415_v36, 0  ;;  %p1807_p7 = por %p1806_p4, %p1805_p3 }
0x1b7e   : > { %v1418_v38 = vshrl.u32 %v1416_v37, 16  ;;  %v1417_v39 = vand.u32 65535, %v1416_v37 }
0x1b7f   : > { %p1808_p8 = pnand %p1807_p7, %p1803_p2 }
0x1b80   : > { %v1420_v40 = vcvt.s32.f32 %v1418_v38  ;;  %v1419_v25 = vcvt.s32.f32 %v1417_v39 }
0x1b82   : > { %1423 = vadd.xlane.f32.xlu2 %v1420_v40  ;;  %1421 = vadd.xlane.f32.xlu0 %v1419_v25 }
0x1bf5   : > { %v1424_v35 = vpop.xlane.xlu2 %1423  ;;  %v1422_v41 = vpop.xlane.xlu0 %1421 }
0x1bf6   : > { %v1426_v42 = vcvt.f32.s32 %v1424_v35  ;;  %v1425_v10 = vcvt.f32.s32 %v1422_v41 }
0x1bf8   : > { %v1427_v4 = vshll.u32 %v1426_v42, 16 }
0x1bfa   : > { %v1428_v44 = vadd.s32 %v1427_v4, %v1425_v10 }
0x1bfc   : > { %v1429_v46 = vrot.slane %v1428_v44, 4 }
0x1bfe   : > { %v1430_v47 = vadd.s32 %v1429_v46, %v1428_v44 }
0x1c00   : > { %v1431_v48 = vrot.slane %v1430_v47, 2 }
0x1c02   : > { %v1432_v49 = vadd.s32 %v1431_v48, %v1430_v47 }
0x1c04   : > { %v1433_v50 = vrot.slane %v1432_v49, 1 }
0x1c06   : > { %v1434_v51 = vadd.s32 %v1433_v50, %v1432_v49 }
0x1c08   : > { %1606 = vpush %v1434_v51 }
0x1c39   : > { %s1607_s17 = spop %1606 }
0x1c3a   : > { %v1437_v52 = vstv %s1607_s17 }
0x1c3b   : > { %v1438_v54 = vsel %vm1436_vm13, %v1437_v52, %v1412_v53 }
0x1c3c   : > { %1439 = vst.msk [vmem:[%s333_s12] sm:$0x1] %vm992_vm0, %v1438_v54 }
0x1c3d   : > { %1811 = shalt.err (!%p1808_p8)
}
0x1c3e   : > { %1616 = dma.vmem_to_hbm [thread:$0]  (%p1947_p5), %s1458_s13, 16, %s1460_s19, %s1444_s20  }
0x1c3f PF: > { %p1633_p9 = scmp.ge.s32.totalorder %s1854_s30, 2  ;;  %s1477_s18 = sand.u32 1, %s1842_s27  }
0x1c40   : > { %s1478_s10 = scalar_lea.sflag [#allocation7], %s1477_s18 }
0x1c41   : > { %p1626_p10 = pnand %p1633_p9, %p1951_p6 }
0x1c43   : > { %p1627_p11 = pneg %p1626_p10 }
0x1c45   : > { %1837 = dma.done.wait (%p1627_p11), %s1478_s10, 16  }
0x1c46   : > { %1839 = vsyncadd (%p1627_p11), %s1478_s10, 4294967280  ;;  %p21_p12 = scmp.ge.s32.totalorder %s1934_s11, 6   ;;  %s2285_s27 = smov %s1846_s28 }
0x1c47   : > { %s2286_s28 = smov %s1850_s29  ;;  %s2287_s29 = smov %s1945_s14 }
0x1c48   : > { %s2288_s30 = smov %s1934_s11  ;;  %23 = sbr.rel (!%p21_p12) target bundleno = 5 (0x5), region = 104 }
0x1c4d   :  { %1483 = vsyncpa [#allocation6], 1 }
0x1c4e   :  { %1485 = vsyncpa [#allocation6 + $0x1], 1 }
0x1c4f   :  { %1486 = vsyncpa [#allocation9], 1 }
0x1c50   :  { %1487 = vsyncpa [#allocation7], 1 }
0x1c51   :  { %1489 = vsyncpa [#allocation7 + $0x1], 1 }

</bundles_post_ra>
